<compile_context>
chip_gen: v6e
topology: v6e:2x2x1
jax: 0.10.0
libtpu: 0.0.40
codegen_flags: <defaults>
</compile_context>

<pallas_src>
import jax
import jax.numpy as jnp
from jax import lax
from jax.experimental import pallas as pl
from jax.experimental.pallas import tpu as pltpu


def lstm_kernel(x_ref, wx_ref, wh_ref, b_ref, wout_ref, bout_ref, out_ref):
    # x_ref:    (B, S)    input sequence
    # wx_ref:   (1, 4H)   fused per-gate weight row for the scalar input x_t
    # wh_ref:   (H, 4H)   fused hidden->gates weight (already transposed)
    # b_ref:    (1, 4H)   fused per-gate bias
    # wout_ref: (1, H)    output_transform weight (as a row)
    # bout_ref: (1, 1)    output_transform bias
    # out_ref:  (B, 1)    final output (before squeeze)
    B, S = x_ref.shape
    H, G = wh_ref.shape  # G == 4 * H

    x = x_ref[...]
    wx = wx_ref[...]
    wh = wh_ref[...]
    b = b_ref[...]

    # Hoisted input projection: one (B, 4H) pre-activation slab per time step.
    # Independent of the recurrent state, so it sits entirely off the serial
    # h/c dependence chain.  Replaces the old per-step iota-mask + lane-reduce.
    pre = [x[:, t:t + 1] * wx + b for t in range(S)]

    # Per-lane constants so that ONE sigmoid over the packed (B, 4H) block
    # yields all four activations:
    #   f, i, o lanes: sigmoid(z)
    #   c~ lanes:      tanh(z) = 2 * sigmoid(2 z) - 1
    lane = lax.broadcasted_iota(jnp.int32, (1, G), 1)
    is_c = jnp.logical_and(lane >= 2 * H, lane < 3 * H)
    g_scale = jnp.where(is_c, 2.0, 1.0).astype(jnp.float32)
    g_shift = jnp.where(is_c, 1.0, 0.0).astype(jnp.float32)

    h = jnp.zeros((B, H), jnp.float32)
    c = jnp.zeros((B, H), jnp.float32)

    # Fully unrolled time loop (S is static): one (B,H)@(H,4H) MXU matmul, one
    # dense EUP sigmoid pass and a handful of VPU ops per step.
    for t in range(S):
        z = pre[t] + jnp.dot(h, wh, preferred_element_type=jnp.float32)  # (B, 4H)
        a = jax.nn.sigmoid(z * g_scale) * g_scale - g_shift
        f = a[:, 0:H]
        i = a[:, H:2 * H]
        g = a[:, 2 * H:3 * H]
        o = a[:, 3 * H:4 * H]
        c = f * c + i * g
        h = o * jnp.tanh(c)

    # output_transform on the final hidden state: N=1 matmul replaced by a
    # VPU multiply + XLU lane reduce (no MXU push for a 1-lane-wide result).
    out_ref[...] = (jnp.sum(h * wout_ref[...], axis=-1, keepdims=True)
                    + bout_ref[...])


def make_params(key, hidden_size):
    """Deterministic PyTorch-Linear-style init (uniform ±1/sqrt(fan_in)),
    packed in the fused gate-major layout [f | i | c~ | o] along the lane axis."""
    H = hidden_size
    ks = jax.random.split(key, 10)
    lim_g = 1.0 / jnp.sqrt(1.0 + H)   # gate linears: in_features = 1 + H
    lim_o = 1.0 / jnp.sqrt(float(H))  # output_transform: in_features = H

    # Gate weights as in nn.Linear: W (H, 1+H), b (H,).  Order: f, i, c~, o.
    Ws = [jax.random.uniform(ks[j], (H, 1 + H), jnp.float32, -lim_g, lim_g)
          for j in range(4)]
    bs = [jax.random.uniform(ks[4 + j], (H,), jnp.float32, -lim_g, lim_g)
          for j in range(4)]

    wx = jnp.concatenate([W[:, 0] for W in Ws], axis=0)[None, :]   # (1, 4H)
    wh = jnp.concatenate([W[:, 1:].T for W in Ws], axis=1)         # (H, 4H)
    b = jnp.concatenate(bs, axis=0)[None, :]                       # (1, 4H)

    W_out = jax.random.uniform(ks[8], (1, H), jnp.float32, -lim_o, lim_o)  # (1, H)
    b_out = jax.random.uniform(ks[9], (1,), jnp.float32, -lim_o, lim_o)
    return dict(wx=wx, wh=wh, b=b, wout=W_out, bout=b_out.reshape(1, 1))


@jax.jit
def lstm_forward(x, params):
    B, S = x.shape
    vmem = pl.BlockSpec(memory_space=pltpu.MemorySpace.VMEM)
    # All operands (<200 KiB at H=32) are whole-array resident in VMEM on every
    # TPU generation, so no grid / pipelining is needed at this size.
    # Scaling notes (per review):
    #  - if H grows, wh is 16*H^2 bytes; raise vmem_limit_bytes via
    #    pltpu.CompilerParams or tile wh with a grid before hitting v7x's
    #    64 MiB VMEM ceiling.
    #  - if B grows, add a batch grid with dimension_semantics=("parallel",)
    #    to use v7x's second TensorCore.
    out = pl.pallas_call(
        lstm_kernel,
        out_shape=jax.ShapeDtypeStruct((B, 1), jnp.float32),
        in_specs=[vmem] * 6,
        out_specs=vmem,
    )(x, params["wx"], params["wh"], params["b"], params["wout"], params["bout"])
    return out[:, 0]  # matches torch .squeeze() for B > 1


def lstm_reference(x, params):
    """Pure-JAX reference mirroring the PyTorch forward exactly (real tanh)."""
    B, S = x.shape
    H = params["wh"].shape[0]
    wx, wh, b = params["wx"], params["wh"], params["b"]
    h = jnp.zeros((B, H), jnp.float32)
    c = jnp.zeros((B, H), jnp.float32)
    for t in range(S):
        z = x[:, t:t + 1] * wx + h @ wh + b            # (B, 4H)
        f = jax.nn.sigmoid(z[:, 0:H])
        i = jax.nn.sigmoid(z[:, H:2 * H])
        g = jnp.tanh(z[:, 2 * H:3 * H])
        o = jax.nn.sigmoid(z[:, 3 * H:4 * H])
        c = f * c + i * g
        h = o * jnp.tanh(c)
    return jnp.sum(h * params["wout"], axis=-1) + params["bout"][0, 0]


if __name__ == "__main__":
    batch_size = 32
    seq_length = 7
    hidden_size = 32

    key = jax.random.PRNGKey(0)
    kx, kp = jax.random.split(key)
    x = jax.random.normal(kx, (batch_size, seq_length), jnp.float32)
    params = make_params(kp, hidden_size)

    out = jax.block_until_ready(lstm_forward(x, params))
    ref = lstm_reference(x, params)

    assert out.shape == (batch_size,)
    # tanh(x) = 2*sigmoid(2x) - 1 rewrite gives only ulp-level differences.
    assert jnp.allclose(out, ref, atol=2e-5, rtol=1e-5), (out, ref)

    print("KERNEL_OK")
</pallas_src>

<mosaic_0001>
module attributes {stable_mosaic.version = 11 : i64} {
  func.func @lstm_kernel(%arg0: memref<32x7xf32, #tpu.memory_space<vmem>>, %arg1: memref<1x128xf32, #tpu.memory_space<vmem>>, %arg2: memref<32x128xf32, #tpu.memory_space<vmem>>, %arg3: memref<1x128xf32, #tpu.memory_space<vmem>>, %arg4: memref<1x32xf32, #tpu.memory_space<vmem>>, %arg5: memref<1x1xf32, #tpu.memory_space<vmem>>, %arg6: memref<32x1xf32, #tpu.memory_space<vmem>>) attributes {dimension_semantics = [], scalar_prefetch = 0 : i64, scratch_operands = 0 : i64, tpu.core_type = #tpu.core_type<tc>} {
    %c0 = arith.constant 0 : index
    %c0_0 = arith.constant 0 : index
    %0 = vector.load %arg0[%c0, %c0_0] : memref<32x7xf32, #tpu.memory_space<vmem>>, vector<32x7xf32>
    %c0_1 = arith.constant 0 : index
    %c0_2 = arith.constant 0 : index
    %1 = vector.load %arg1[%c0_1, %c0_2] : memref<1x128xf32, #tpu.memory_space<vmem>>, vector<1x128xf32>
    %c0_3 = arith.constant 0 : index
    %c0_4 = arith.constant 0 : index
    %2 = vector.load %arg2[%c0_3, %c0_4] : memref<32x128xf32, #tpu.memory_space<vmem>>, vector<32x128xf32>
    %c0_5 = arith.constant 0 : index
    %c0_6 = arith.constant 0 : index
    %3 = vector.load %arg3[%c0_5, %c0_6] : memref<1x128xf32, #tpu.memory_space<vmem>>, vector<1x128xf32>
    %4 = vector.extract_strided_slice %0 {offsets = [0, 0], sizes = [32, 1], strides = [1, 1]} : vector<32x7xf32> to vector<32x1xf32>
    %5 = vector.broadcast %4 : vector<32x1xf32> to vector<32x128xf32>
    %6 = vector.broadcast %1 : vector<1x128xf32> to vector<32x128xf32>
    %7 = arith.mulf %5, %6 : vector<32x128xf32>
    %8 = vector.broadcast %3 : vector<1x128xf32> to vector<32x128xf32>
    %9 = arith.addf %7, %8 : vector<32x128xf32>
    %10 = vector.extract_strided_slice %0 {offsets = [0, 1], sizes = [32, 1], strides = [1, 1]} : vector<32x7xf32> to vector<32x1xf32>
    %11 = vector.broadcast %10 : vector<32x1xf32> to vector<32x128xf32>
    %12 = vector.broadcast %1 : vector<1x128xf32> to vector<32x128xf32>
    %13 = arith.mulf %11, %12 : vector<32x128xf32>
    %14 = vector.broadcast %3 : vector<1x128xf32> to vector<32x128xf32>
    %15 = arith.addf %13, %14 : vector<32x128xf32>
    %16 = vector.extract_strided_slice %0 {offsets = [0, 2], sizes = [32, 1], strides = [1, 1]} : vector<32x7xf32> to vector<32x1xf32>
    %17 = vector.broadcast %16 : vector<32x1xf32> to vector<32x128xf32>
    %18 = vector.broadcast %1 : vector<1x128xf32> to vector<32x128xf32>
    %19 = arith.mulf %17, %18 : vector<32x128xf32>
    %20 = vector.broadcast %3 : vector<1x128xf32> to vector<32x128xf32>
    %21 = arith.addf %19, %20 : vector<32x128xf32>
    %22 = vector.extract_strided_slice %0 {offsets = [0, 3], sizes = [32, 1], strides = [1, 1]} : vector<32x7xf32> to vector<32x1xf32>
    %23 = vector.broadcast %22 : vector<32x1xf32> to vector<32x128xf32>
    %24 = vector.broadcast %1 : vector<1x128xf32> to vector<32x128xf32>
    %25 = arith.mulf %23, %24 : vector<32x128xf32>
    %26 = vector.broadcast %3 : vector<1x128xf32> to vector<32x128xf32>
    %27 = arith.addf %25, %26 : vector<32x128xf32>
    %28 = vector.extract_strided_slice %0 {offsets = [0, 4], sizes = [32, 1], strides = [1, 1]} : vector<32x7xf32> to vector<32x1xf32>
    %29 = vector.broadcast %28 : vector<32x1xf32> to vector<32x128xf32>
    %30 = vector.broadcast %1 : vector<1x128xf32> to vector<32x128xf32>
    %31 = arith.mulf %29, %30 : vector<32x128xf32>
    %32 = vector.broadcast %3 : vector<1x128xf32> to vector<32x128xf32>
    %33 = arith.addf %31, %32 : vector<32x128xf32>
    %34 = vector.extract_strided_slice %0 {offsets = [0, 5], sizes = [32, 1], strides = [1, 1]} : vector<32x7xf32> to vector<32x1xf32>
    %35 = vector.broadcast %34 : vector<32x1xf32> to vector<32x128xf32>
    %36 = vector.broadcast %1 : vector<1x128xf32> to vector<32x128xf32>
    %37 = arith.mulf %35, %36 : vector<32x128xf32>
    %38 = vector.broadcast %3 : vector<1x128xf32> to vector<32x128xf32>
    %39 = arith.addf %37, %38 : vector<32x128xf32>
    %40 = vector.extract_strided_slice %0 {offsets = [0, 6], sizes = [32, 1], strides = [1, 1]} : vector<32x7xf32> to vector<32x1xf32>
    %41 = vector.broadcast %40 : vector<32x1xf32> to vector<32x128xf32>
    %42 = vector.broadcast %1 : vector<1x128xf32> to vector<32x128xf32>
    %43 = arith.mulf %41, %42 : vector<32x128xf32>
    %44 = vector.broadcast %3 : vector<1x128xf32> to vector<32x128xf32>
    %45 = arith.addf %43, %44 : vector<32x128xf32>
    %46 = tpu.iota {dimensions = array<i32: 1>} : vector<1x128xi32>
    %c64_i32 = arith.constant 64 : i32
    %47 = vector.broadcast %c64_i32 : i32 to vector<1x128xi32>
    %48 = arith.cmpi sge, %46, %47 : vector<1x128xi32>
    %c96_i32 = arith.constant 96 : i32
    %49 = vector.broadcast %c96_i32 : i32 to vector<1x128xi32>
    %50 = arith.cmpi slt, %46, %49 : vector<1x128xi32>
    %51 = arith.andi %48, %50 : vector<1x128xi1>
    %cst = arith.constant 2.000000e+00 : f32
    %cst_7 = arith.constant 1.000000e+00 : f32
    %52 = vector.broadcast %cst : f32 to vector<1x128xf32>
    %53 = vector.broadcast %cst_7 : f32 to vector<1x128xf32>
    %54 = arith.select %51, %52, %53 : vector<1x128xi1>, vector<1x128xf32>
    %cst_8 = arith.constant 1.000000e+00 : f32
    %cst_9 = arith.constant 0.000000e+00 : f32
    %55 = vector.broadcast %cst_8 : f32 to vector<1x128xf32>
    %56 = vector.broadcast %cst_9 : f32 to vector<1x128xf32>
    %57 = arith.select %51, %55, %56 : vector<1x128xi1>, vector<1x128xf32>
    %cst_10 = arith.constant 0.000000e+00 : f32
    %58 = vector.broadcast %cst_10 : f32 to vector<32x32xf32>
    %cst_11 = arith.constant 0.000000e+00 : f32
    %59 = vector.broadcast %cst_11 : f32 to vector<32x32xf32>
    %cst_12 = arith.constant dense<0.000000e+00> : vector<32x128xf32>
    %60 = tpu.matmul %58, %2, %cst_12 {dimension_numbers = #tpu.dot_dimension_numbers<[1], [0], [0], [1], [0, 0, 1, 1], [], []>} : vector<32x32xf32>, vector<32x128xf32>, vector<32x128xf32> -> vector<32x128xf32>
    %61 = arith.addf %9, %60 : vector<32x128xf32>
    %62 = vector.broadcast %54 : vector<1x128xf32> to vector<32x128xf32>
    %63 = arith.mulf %61, %62 : vector<32x128xf32>
    %64 = arith.negf %63 : vector<32x128xf32>
    %65 = math.exp %64 : vector<32x128xf32>
    %cst_13 = arith.constant 1.000000e+00 : f32
    %66 = vector.broadcast %cst_13 : f32 to vector<32x128xf32>
    %67 = arith.addf %66, %65 : vector<32x128xf32>
    %68 = arith.divf %66, %67 : vector<32x128xf32>
    %69 = vector.broadcast %54 : vector<1x128xf32> to vector<32x128xf32>
    %70 = arith.mulf %68, %69 : vector<32x128xf32>
    %71 = vector.broadcast %57 : vector<1x128xf32> to vector<32x128xf32>
    %72 = arith.subf %70, %71 : vector<32x128xf32>
    %73 = vector.extract_strided_slice %72 {offsets = [0, 0], sizes = [32, 32], strides = [1, 1]} : vector<32x128xf32> to vector<32x32xf32>
    %74 = vector.extract_strided_slice %72 {offsets = [0, 32], sizes = [32, 32], strides = [1, 1]} : vector<32x128xf32> to vector<32x32xf32>
    %75 = vector.extract_strided_slice %72 {offsets = [0, 64], sizes = [32, 32], strides = [1, 1]} : vector<32x128xf32> to vector<32x32xf32>
    %76 = vector.extract_strided_slice %72 {offsets = [0, 96], sizes = [32, 32], strides = [1, 1]} : vector<32x128xf32> to vector<32x32xf32>
    %77 = arith.mulf %73, %59 : vector<32x32xf32>
    %78 = arith.mulf %74, %75 : vector<32x32xf32>
    %79 = arith.addf %77, %78 : vector<32x32xf32>
    %80 = math.tanh %79 : vector<32x32xf32>
    %81 = arith.mulf %76, %80 : vector<32x32xf32>
    %cst_14 = arith.constant dense<0.000000e+00> : vector<32x128xf32>
    %82 = tpu.matmul %81, %2, %cst_14 {dimension_numbers = #tpu.dot_dimension_numbers<[1], [0], [0], [1], [0, 0, 1, 1], [], []>} : vector<32x32xf32>, vector<32x128xf32>, vector<32x128xf32> -> vector<32x128xf32>
    %83 = arith.addf %15, %82 : vector<32x128xf32>
    %84 = vector.broadcast %54 : vector<1x128xf32> to vector<32x128xf32>
    %85 = arith.mulf %83, %84 : vector<32x128xf32>
    %86 = arith.negf %85 : vector<32x128xf32>
    %87 = math.exp %86 : vector<32x128xf32>
    %cst_15 = arith.constant 1.000000e+00 : f32
    %88 = vector.broadcast %cst_15 : f32 to vector<32x128xf32>
    %89 = arith.addf %88, %87 : vector<32x128xf32>
    %90 = arith.divf %88, %89 : vector<32x128xf32>
    %91 = vector.broadcast %54 : vector<1x128xf32> to vector<32x128xf32>
    %92 = arith.mulf %90, %91 : vector<32x128xf32>
    %93 = vector.broadcast %57 : vector<1x128xf32> to vector<32x128xf32>
    %94 = arith.subf %92, %93 : vector<32x128xf32>
    %95 = vector.extract_strided_slice %94 {offsets = [0, 0], sizes = [32, 32], strides = [1, 1]} : vector<32x128xf32> to vector<32x32xf32>
    %96 = vector.extract_strided_slice %94 {offsets = [0, 32], sizes = [32, 32], strides = [1, 1]} : vector<32x128xf32> to vector<32x32xf32>
    %97 = vector.extract_strided_slice %94 {offsets = [0, 64], sizes = [32, 32], strides = [1, 1]} : vector<32x128xf32> to vector<32x32xf32>
    %98 = vector.extract_strided_slice %94 {offsets = [0, 96], sizes = [32, 32], strides = [1, 1]} : vector<32x128xf32> to vector<32x32xf32>
    %99 = arith.mulf %95, %79 : vector<32x32xf32>
    %100 = arith.mulf %96, %97 : vector<32x32xf32>
    %101 = arith.addf %99, %100 : vector<32x32xf32>
    %102 = math.tanh %101 : vector<32x32xf32>
    %103 = arith.mulf %98, %102 : vector<32x32xf32>
    %cst_16 = arith.constant dense<0.000000e+00> : vector<32x128xf32>
    %104 = tpu.matmul %103, %2, %cst_16 {dimension_numbers = #tpu.dot_dimension_numbers<[1], [0], [0], [1], [0, 0, 1, 1], [], []>} : vector<32x32xf32>, vector<32x128xf32>, vector<32x128xf32> -> vector<32x128xf32>
    %105 = arith.addf %21, %104 : vector<32x128xf32>
    %106 = vector.broadcast %54 : vector<1x128xf32> to vector<32x128xf32>
    %107 = arith.mulf %105, %106 : vector<32x128xf32>
    %108 = arith.negf %107 : vector<32x128xf32>
    %109 = math.exp %108 : vector<32x128xf32>
    %cst_17 = arith.constant 1.000000e+00 : f32
    %110 = vector.broadcast %cst_17 : f32 to vector<32x128xf32>
    %111 = arith.addf %110, %109 : vector<32x128xf32>
    %112 = arith.divf %110, %111 : vector<32x128xf32>
    %113 = vector.broadcast %54 : vector<1x128xf32> to vector<32x128xf32>
    %114 = arith.mulf %112, %113 : vector<32x128xf32>
    %115 = vector.broadcast %57 : vector<1x128xf32> to vector<32x128xf32>
    %116 = arith.subf %114, %115 : vector<32x128xf32>
    %117 = vector.extract_strided_slice %116 {offsets = [0, 0], sizes = [32, 32], strides = [1, 1]} : vector<32x128xf32> to vector<32x32xf32>
    %118 = vector.extract_strided_slice %116 {offsets = [0, 32], sizes = [32, 32], strides = [1, 1]} : vector<32x128xf32> to vector<32x32xf32>
    %119 = vector.extract_strided_slice %116 {offsets = [0, 64], sizes = [32, 32], strides = [1, 1]} : vector<32x128xf32> to vector<32x32xf32>
    %120 = vector.extract_strided_slice %116 {offsets = [0, 96], sizes = [32, 32], strides = [1, 1]} : vector<32x128xf32> to vector<32x32xf32>
    %121 = arith.mulf %117, %101 : vector<32x32xf32>
    %122 = arith.mulf %118, %119 : vector<32x32xf32>
    %123 = arith.addf %121, %122 : vector<32x32xf32>
    %124 = math.tanh %123 : vector<32x32xf32>
    %125 = arith.mulf %120, %124 : vector<32x32xf32>
    %cst_18 = arith.constant dense<0.000000e+00> : vector<32x128xf32>
    %126 = tpu.matmul %125, %2, %cst_18 {dimension_numbers = #tpu.dot_dimension_numbers<[1], [0], [0], [1], [0, 0, 1, 1], [], []>} : vector<32x32xf32>, vector<32x128xf32>, vector<32x128xf32> -> vector<32x128xf32>
    %127 = arith.addf %27, %126 : vector<32x128xf32>
    %128 = vector.broadcast %54 : vector<1x128xf32> to vector<32x128xf32>
    %129 = arith.mulf %127, %128 : vector<32x128xf32>
    %130 = arith.negf %129 : vector<32x128xf32>
    %131 = math.exp %130 : vector<32x128xf32>
    %cst_19 = arith.constant 1.000000e+00 : f32
    %132 = vector.broadcast %cst_19 : f32 to vector<32x128xf32>
    %133 = arith.addf %132, %131 : vector<32x128xf32>
    %134 = arith.divf %132, %133 : vector<32x128xf32>
    %135 = vector.broadcast %54 : vector<1x128xf32> to vector<32x128xf32>
    %136 = arith.mulf %134, %135 : vector<32x128xf32>
    %137 = vector.broadcast %57 : vector<1x128xf32> to vector<32x128xf32>
    %138 = arith.subf %136, %137 : vector<32x128xf32>
    %139 = vector.extract_strided_slice %138 {offsets = [0, 0], sizes = [32, 32], strides = [1, 1]} : vector<32x128xf32> to vector<32x32xf32>
    %140 = vector.extract_strided_slice %138 {offsets = [0, 32], sizes = [32, 32], strides = [1, 1]} : vector<32x128xf32> to vector<32x32xf32>
    %141 = vector.extract_strided_slice %138 {offsets = [0, 64], sizes = [32, 32], strides = [1, 1]} : vector<32x128xf32> to vector<32x32xf32>
    %142 = vector.extract_strided_slice %138 {offsets = [0, 96], sizes = [32, 32], strides = [1, 1]} : vector<32x128xf32> to vector<32x32xf32>
    %143 = arith.mulf %139, %123 : vector<32x32xf32>
    %144 = arith.mulf %140, %141 : vector<32x32xf32>
    %145 = arith.addf %143, %144 : vector<32x32xf32>
    %146 = math.tanh %145 : vector<32x32xf32>
    %147 = arith.mulf %142, %146 : vector<32x32xf32>
    %cst_20 = arith.constant dense<0.000000e+00> : vector<32x128xf32>
    %148 = tpu.matmul %147, %2, %cst_20 {dimension_numbers = #tpu.dot_dimension_numbers<[1], [0], [0], [1], [0, 0, 1, 1], [], []>} : vector<32x32xf32>, vector<32x128xf32>, vector<32x128xf32> -> vector<32x128xf32>
    %149 = arith.addf %33, %148 : vector<32x128xf32>
    %150 = vector.broadcast %54 : vector<1x128xf32> to vector<32x128xf32>
    %151 = arith.mulf %149, %150 : vector<32x128xf32>
    %152 = arith.negf %151 : vector<32x128xf32>
    %153 = math.exp %152 : vector<32x128xf32>
    %cst_21 = arith.constant 1.000000e+00 : f32
    %154 = vector.broadcast %cst_21 : f32 to vector<32x128xf32>
    %155 = arith.addf %154, %153 : vector<32x128xf32>
    %156 = arith.divf %154, %155 : vector<32x128xf32>
    %157 = vector.broadcast %54 : vector<1x128xf32> to vector<32x128xf32>
    %158 = arith.mulf %156, %157 : vector<32x128xf32>
    %159 = vector.broadcast %57 : vector<1x128xf32> to vector<32x128xf32>
    %160 = arith.subf %158, %159 : vector<32x128xf32>
    %161 = vector.extract_strided_slice %160 {offsets = [0, 0], sizes = [32, 32], strides = [1, 1]} : vector<32x128xf32> to vector<32x32xf32>
    %162 = vector.extract_strided_slice %160 {offsets = [0, 32], sizes = [32, 32], strides = [1, 1]} : vector<32x128xf32> to vector<32x32xf32>
    %163 = vector.extract_strided_slice %160 {offsets = [0, 64], sizes = [32, 32], strides = [1, 1]} : vector<32x128xf32> to vector<32x32xf32>
    %164 = vector.extract_strided_slice %160 {offsets = [0, 96], sizes = [32, 32], strides = [1, 1]} : vector<32x128xf32> to vector<32x32xf32>
    %165 = arith.mulf %161, %145 : vector<32x32xf32>
    %166 = arith.mulf %162, %163 : vector<32x32xf32>
    %167 = arith.addf %165, %166 : vector<32x32xf32>
    %168 = math.tanh %167 : vector<32x32xf32>
    %169 = arith.mulf %164, %168 : vector<32x32xf32>
    %cst_22 = arith.constant dense<0.000000e+00> : vector<32x128xf32>
    %170 = tpu.matmul %169, %2, %cst_22 {dimension_numbers = #tpu.dot_dimension_numbers<[1], [0], [0], [1], [0, 0, 1, 1], [], []>} : vector<32x32xf32>, vector<32x128xf32>, vector<32x128xf32> -> vector<32x128xf32>
    %171 = arith.addf %39, %170 : vector<32x128xf32>
    %172 = vector.broadcast %54 : vector<1x128xf32> to vector<32x128xf32>
    %173 = arith.mulf %171, %172 : vector<32x128xf32>
    %174 = arith.negf %173 : vector<32x128xf32>
    %175 = math.exp %174 : vector<32x128xf32>
    %cst_23 = arith.constant 1.000000e+00 : f32
    %176 = vector.broadcast %cst_23 : f32 to vector<32x128xf32>
    %177 = arith.addf %176, %175 : vector<32x128xf32>
    %178 = arith.divf %176, %177 : vector<32x128xf32>
    %179 = vector.broadcast %54 : vector<1x128xf32> to vector<32x128xf32>
    %180 = arith.mulf %178, %179 : vector<32x128xf32>
    %181 = vector.broadcast %57 : vector<1x128xf32> to vector<32x128xf32>
    %182 = arith.subf %180, %181 : vector<32x128xf32>
    %183 = vector.extract_strided_slice %182 {offsets = [0, 0], sizes = [32, 32], strides = [1, 1]} : vector<32x128xf32> to vector<32x32xf32>
    %184 = vector.extract_strided_slice %182 {offsets = [0, 32], sizes = [32, 32], strides = [1, 1]} : vector<32x128xf32> to vector<32x32xf32>
    %185 = vector.extract_strided_slice %182 {offsets = [0, 64], sizes = [32, 32], strides = [1, 1]} : vector<32x128xf32> to vector<32x32xf32>
    %186 = vector.extract_strided_slice %182 {offsets = [0, 96], sizes = [32, 32], strides = [1, 1]} : vector<32x128xf32> to vector<32x32xf32>
    %187 = arith.mulf %183, %167 : vector<32x32xf32>
    %188 = arith.mulf %184, %185 : vector<32x32xf32>
    %189 = arith.addf %187, %188 : vector<32x32xf32>
    %190 = math.tanh %189 : vector<32x32xf32>
    %191 = arith.mulf %186, %190 : vector<32x32xf32>
    %cst_24 = arith.constant dense<0.000000e+00> : vector<32x128xf32>
    %192 = tpu.matmul %191, %2, %cst_24 {dimension_numbers = #tpu.dot_dimension_numbers<[1], [0], [0], [1], [0, 0, 1, 1], [], []>} : vector<32x32xf32>, vector<32x128xf32>, vector<32x128xf32> -> vector<32x128xf32>
    %193 = arith.addf %45, %192 : vector<32x128xf32>
    %194 = vector.broadcast %54 : vector<1x128xf32> to vector<32x128xf32>
    %195 = arith.mulf %193, %194 : vector<32x128xf32>
    %196 = arith.negf %195 : vector<32x128xf32>
    %197 = math.exp %196 : vector<32x128xf32>
    %cst_25 = arith.constant 1.000000e+00 : f32
    %198 = vector.broadcast %cst_25 : f32 to vector<32x128xf32>
    %199 = arith.addf %198, %197 : vector<32x128xf32>
    %200 = arith.divf %198, %199 : vector<32x128xf32>
    %201 = vector.broadcast %54 : vector<1x128xf32> to vector<32x128xf32>
    %202 = arith.mulf %200, %201 : vector<32x128xf32>
    %203 = vector.broadcast %57 : vector<1x128xf32> to vector<32x128xf32>
    %204 = arith.subf %202, %203 : vector<32x128xf32>
    %205 = vector.extract_strided_slice %204 {offsets = [0, 0], sizes = [32, 32], strides = [1, 1]} : vector<32x128xf32> to vector<32x32xf32>
    %206 = vector.extract_strided_slice %204 {offsets = [0, 32], sizes = [32, 32], strides = [1, 1]} : vector<32x128xf32> to vector<32x32xf32>
    %207 = vector.extract_strided_slice %204 {offsets = [0, 64], sizes = [32, 32], strides = [1, 1]} : vector<32x128xf32> to vector<32x32xf32>
    %208 = vector.extract_strided_slice %204 {offsets = [0, 96], sizes = [32, 32], strides = [1, 1]} : vector<32x128xf32> to vector<32x32xf32>
    %209 = arith.mulf %205, %189 : vector<32x32xf32>
    %210 = arith.mulf %206, %207 : vector<32x32xf32>
    %211 = arith.addf %209, %210 : vector<32x32xf32>
    %212 = math.tanh %211 : vector<32x32xf32>
    %213 = arith.mulf %208, %212 : vector<32x32xf32>
    %c0_26 = arith.constant 0 : index
    %c0_27 = arith.constant 0 : index
    %214 = vector.load %arg4[%c0_26, %c0_27] : memref<1x32xf32, #tpu.memory_space<vmem>>, vector<1x32xf32>
    %215 = vector.broadcast %214 : vector<1x32xf32> to vector<32x32xf32>
    %216 = arith.mulf %213, %215 : vector<32x32xf32>
    %cst_28 = arith.constant dense<0.000000e+00> : vector<32xf32>
    %217 = vector.multi_reduction <add>, %216, %cst_28 [1] : vector<32x32xf32> to vector<32xf32>
    %218 = vector.shape_cast %217 : vector<32xf32> to vector<32x1xf32>
    %c0_29 = arith.constant 0 : index
    %c0_30 = arith.constant 0 : index
    %219 = vector.load %arg5[%c0_29, %c0_30] : memref<1x1xf32, #tpu.memory_space<vmem>>, vector<1x1xf32>
    %220 = vector.broadcast %219 : vector<1x1xf32> to vector<32x1xf32>
    %221 = arith.addf %218, %220 : vector<32x1xf32>
    %c0_31 = arith.constant 0 : index
    %c0_32 = arith.constant 0 : index
    %222 = vector.load %arg6[%c0_31, %c0_32] : memref<32x1xf32, #tpu.memory_space<vmem>>, vector<32x1xf32>
    tpu.vector_store %arg6[%c0_31, %c0_32], %221 {strides = array<i32>} : memref<32x1xf32, #tpu.memory_space<vmem>>, vector<32x1xf32>,
    return
  }
}

</mosaic_0001>

<bundles_post_ra>
// kernel: lstm_forward.1
= control target key start
LH: loop header
LB: loop body
LE: loop exit
PB: predicated region body
PF: predicated region fallthrough
CT: control target
= control target key end

     0   :  { %v2183_v2 = vmov 0.0   ;;  %v2184_v3 = vmov 0   ;;  %v219_v11 = vlaneseq  ;;  %v2185_v23 = vmov 1.0   ;;  %s2186_s17 = smov 96   ;;  %s2188_s18 = smov 32   ;;  %s2833_s2 = inlined_call_operand.vmem [shape: f32[32,128], index: 2, kind: input, shape index: {}]   ;;  %s2834_s0 = inlined_call_operand.vmem [shape: f32[32,7], index: 0, kind: input, shape index: {}]   ;;  %s2835_s1 = inlined_call_operand.vmem [shape: f32[1,128], index: 1, kind: input, shape index: {}]   ;;  %s2836_s3 = inlined_call_operand.vmem [shape: f32[1,128], index: 3, kind: input, shape index: {}]   ;;  %s2837_s4 = inlined_call_operand.vmem [shape: f32[1,32], index: 4, kind: input, shape index: {}]   ;;  %s2838_s5 = inlined_call_operand.<no memory space> [shape: f32[1,1], index: 5, kind: input, shape index: {}]   ;;  %s2839_s6 = inlined_call_operand.vmem [shape: f32[32,1], index: 6, kind: output, shape index: {}]  }
   0x1   :  { %v2232_v0 = vld [vmem:[%s2833_s2 + $0x18] sm:$0xff]  ;;  %v2237_v1 = vld [vmem:[%s2833_s2 + $0x10] sm:$0xff]  ;;  %1882 = vmatprep.mubr.f32.mxu0 %v2183_v2  ;;  %1991 = vset.pattern.permute.xlu0 %v2184_v3  ;;  %v2244_v4 = vld [vmem:[%s2834_s0] sm:$0xff]  ;;  %vm226_vm3 = vcmask 261120   ;;  %vm1753_vm4 = vcmask 7168  }
   0x2   :  { %1874 = vmatprep.subr.mxu0 %v2232_v0  ;;  %1992 = vset.pattern.permute.xlu1 %v2184_v3  ;;  %v2249_v5 = vld [vmem:[%s2834_s0 + $0x10] sm:$0xff]  ;;  %v2255_v6 = vld [vmem:[%s2833_s2 + $0x8] sm:$0xff]  ;;  %v2269_v8 = vld [vmem:[%s2833_s2] sm:$0xff]  ;;  %v220_v13 = vand.u32 127, %v219_v11 }
   0x3   :  { %1875 = vmatpush3.msra.mxu0 %v2232_v0  ;;  %37 = vperm.xlu0 %1991, %v2244_v4   ;;  %v2263_v7 = vld [vmem:[%s2834_s0 + $0x8] sm:$0xff]  ;;  %v2274_v9 = vld [vmem:[%s2834_s0 + $0x18] sm:$0xff]  ;;  %v2306_v14 = vld [vmem:[%s2835_s1] ss:$0 sm:$0xff] }
   0x4   :  { %1876 = vmatprep.subr.mxu0 %v2237_v1  ;;  %47 = vperm.xlu1 %1992, %v2249_v5   ;;  %vm221_vm0 = vcmp.ge.s32.totalorder %v220_v13, 64  ;;  %vm222_vm1 = vcmp.lt.s32.totalorder %v220_v13, 96  ;;  %v2312_v18 = vld [vmem:[%s2836_s3] ss:$0 sm:$0xff] }
   0x5   :  { %1877 = vmatpush3.msra.mxu0 %v2237_v1  ;;  %1888 = vmatprep.subr.mxu1 %v2232_v0  ;;  %vm2314_vm2 = vmand %vm221_vm0, %vm222_vm1 }
   0x6   :  { %1878 = vmatprep.subr.mxu0 %v2255_v6  ;;  %1889 = vmatpush3.msra.mxu1 %v2232_v0  ;;  %v2323_v24 = vsel %vm2314_vm2, 2.0, %v2185_v23  ;;  %v2336_v54 = vsel %vm2314_vm2, 1.0, %v2183_v2 }
   0x7   :  { %1879 = vmatpush3.msra.mxu0 %v2255_v6  ;;  %42 = vperm.xlu0 %1991, %v2263_v7  }
   0x8   :  { %1880 = vmatprep.subr.mxu0 %v2269_v8  ;;  %52 = vperm.xlu1 %1992, %v2274_v9  }
   0x9   :  { %1881 = vmatpush3.msra.mxu0 %v2269_v8  ;;  %1890 = vmatprep.subr.mxu1 %v2237_v1 }
   0xa   :  { %1883 = vmatmul.mubr.f32.vlgmr.msra.gmra.mxu0 %v2183_v2  ;;  %1891 = vmatpush3.msra.mxu1 %v2237_v1 }
   0xb   :  { %1885 = vmatprep.mubr.f32.mxu0 %v2183_v2  ;;  %1892 = vmatprep.subr.mxu1 %v2255_v6 }
   0xc   :  { %1893 = vmatpush3.msra.mxu1 %v2255_v6  ;;  %1902 = vmatprep.subr.mxu0 %v2232_v0 }
   0xd   :  { %1894 = vmatprep.subr.mxu1 %v2269_v8  ;;  %1903 = vmatpush3.msra.mxu0 %v2232_v0 }
   0xe   :  { %1886 = vmatmul.mubr.f32.gmra.mxu0 %v2183_v2  ;;  %1895 = vmatpush3.msra.mxu1 %v2269_v8 }
   0xf   :  { %1904 = vmatprep.subr.mxu0 %v2237_v1  ;;  %1916 = vmatprep.subr.mxu1 %v2232_v0 }
  0x10   :  { %1905 = vmatpush3.msra.mxu0 %v2237_v1 }
  0x11   :  { %1906 = vmatprep.subr.mxu0 %v2255_v6 }
  0x12   :  { %1907 = vmatpush3.msra.mxu0 %v2255_v6 }
  0x13   :  { %1908 = vmatprep.subr.mxu0 %v2269_v8 }
  0x14   :  { %1909 = vmatpush3.msra.mxu0 %v2269_v8 }
  0x15   :  { %1930 = vmatprep.subr.mxu0 %v2232_v0 }
  0x7e   :  { %v38_v10 = vpop.permute.xlu0 %37 }
  0x7f   :  { %v48_v12 = vpop.permute.xlu1 %47  ;;  %v61_v20 = vmul.f32 %v2306_v14, %v38_v10 }
  0x80   :  { %v63_v26 = vmul.f32 %v2306_v14, %v48_v12 }
  0x81   :  { %v71_v28 = vadd.f32 %v2312_v18, %v61_v20 }
  0x82   :  { %v43_v15 = vpop.permute.xlu0 %42  ;;  %v73_v37 = vadd.f32 %v2312_v18, %v63_v26 }
  0x83   :  { %v62_v16 = vmul.f32 %v2306_v14, %v43_v15  ;;  %v53_v17 = vpop.permute.xlu1 %52 }
  0x84   :  { %v64_v21 = vmul.f32 %v2306_v14, %v53_v17 }
  0x85   :  { %v72_v22 = vadd.f32 %v2312_v18, %v62_v16 }
  0x86   :  { %v74_v29 = vadd.f32 %v2312_v18, %v64_v21 }
  0xca   :  { %v1884_v25 = vpop.f32.mrf.mxu0 }
  0xcb   :  { %v316_v27 = vadd.f32 %v1884_v25, %v72_v22 }
  0xcc   :  { %v296_v30 = vpop.f32.mrf.mxu0 }
  0xcd   :  { %v320_v31 = vmul.f32 %v316_v27, %v2323_v24  ;;  %v315_v32 = vadd.f32 %v296_v30, %v71_v28 }
  0xce   :  { %v1887_v33 = vpop.f32.mrf.mxu0 }
  0xcf   :  { %v1765_v34 = vmul.f32 -1.442695, %v320_v31  ;;  %v319_v35 = vmul.f32 %v315_v32, %v2323_v24  ;;  %v318_v36 = vadd.f32 %v1887_v33, %v74_v29 }
  0xd0   :  { %v306_v38 = vpop.f32.mrf.mxu0 }
  0xd1   :  { %2005 = vpow2.f32 %v1765_v34  ;;  %v1764_v39 = vmul.f32 -1.442695, %v319_v35  ;;  %v322_v40 = vmul.f32 %v318_v36, %v2323_v24  ;;  %v317_v41 = vadd.f32 %v306_v38, %v73_v37 }
  0xd2   :  { %v2187_v37 = vmov 1  }
  0xd3   :  { %2007 = vpow2.f32 %v1764_v39  ;;  %v1767_v42 = vmul.f32 -1.442695, %v322_v40  ;;  %v321_v43 = vmul.f32 %v317_v41, %v2323_v24  ;;  %1994 = vset.pattern.permute.xlu1 %v2187_v37  ;;  %1993 = vset.pattern.permute.xlu0 %v2187_v37 }
  0xd5   :  { %2009 = vpow2.f32 %v1767_v42  ;;  %v1766_v44 = vmul.f32 -1.442695, %v321_v43 }
  0xd7   :  { %2011 = vpow2.f32 %v1766_v44 }
  0xde   :  { %v2006_v45 = vpop.eup %2005 }
  0xdf   :  { %v336_v46 = vadd.f32 1.0, %v2006_v45 }
  0xe0   :  { %v2008_v47 = vpop.eup %2007 }
  0xe1   :  { %2013 = vrcp.f32 %v336_v46  ;;  %v335_v48 = vadd.f32 1.0, %v2008_v47 }
  0xe2   :  { %v2010_v49 = vpop.eup %2009 }
  0xe3   :  { %2015 = vrcp.f32 %v335_v48  ;;  %v338_v50 = vadd.f32 1.0, %v2010_v49 }
  0xe4   :  { %v2012_v51 = vpop.eup %2011 }
  0xe5   :  { %2017 = vrcp.f32 %v338_v50  ;;  %v337_v52 = vadd.f32 1.0, %v2012_v51 }
  0xe7   :  { %2019 = vrcp.f32 %v337_v52 }
  0xee   :  { %v2014_v53 = vpop.eup %2013 }
  0xef   :  { %v348_v55 = vmul.f32 %v2014_v53, %v2323_v24 }
  0xf0   :  { %v2016_v56 = vpop.eup %2015 }
  0xf1   :  { %v352_v57 = vsub.f32 %v348_v55, %v2336_v54  ;;  %v347_v58 = vmul.f32 %v2016_v56, %v2323_v24 }
  0xf2   :  { %v2018_v59 = vpop.eup %2017 }
  0xf3   :  { %365 = vrot.lane.b32.xlu1 %v352_v57, %s2186_s17  ;;  %v351_v60 = vsub.f32 %v347_v58, %v2336_v54  ;;  %v350_v61 = vmul.f32 %v2018_v59, %v2323_v24  ;;  %v356_v20 = vmul.f32 0.0, %v352_v57 }
  0xf4   :  { %v2020_v62 = vpop.eup %2019 }
  0xf5   :  { %363 = vrot.lane.b32.xlu0 %v351_v60, %s2186_s17  ;;  %v354_v63 = vsub.f32 %v350_v61, %v2336_v54  ;;  %v349_v2 = vmul.f32 %v2020_v62, %v2323_v24  ;;  %v355_v23 = vmul.f32 0.0, %v351_v60 }
  0xf7   :  { %369 = vrot.lane.b32.xlu1 %v354_v63, %s2186_s17  ;;  %v353_v3 = vsub.f32 %v349_v2, %v2336_v54  ;;  %v358_v27 = vmul.f32 0.0, %v354_v63 }
  0xf9   :  { %367 = vrot.lane.b32.xlu0 %v353_v3, %s2186_s17  ;;  %v357_v30 = vmul.f32 0.0, %v353_v3 }
 0x165   :  { %v366_v10 = vpop.permute.xlu1 %365 }
 0x166   :  { %v376_v11 = vmul.f32 %v366_v10, %v352_v57 }
 0x167   :  { %v364_v12 = vpop.permute.xlu0 %363 }
 0x168   :  { %v375_v13 = vmul.f32 %v364_v12, %v351_v60  ;;  %385 = vrot.lane.b32.xlu1 %v376_v11, %s2186_s17 }
 0x169   :  { %v370_v15 = vpop.permute.xlu1 %369 }
 0x16a   :  { %v378_v16 = vmul.f32 %v370_v15, %v354_v63  ;;  %383 = vrot.lane.b32.xlu0 %v375_v13, %s2186_s17 }
 0x16b   :  { %v368_v17 = vpop.permute.xlu0 %367 }
 0x16c   :  { %v377_v19 = vmul.f32 %v368_v17, %v353_v3  ;;  %389 = vrot.lane.b32.xlu1 %v378_v16, %s2186_s17 }
 0x16e   :  { %387 = vrot.lane.b32.xlu0 %v377_v19, %s2186_s17 }
 0x1da   :  { %v386_v21 = vpop.permute.xlu1 %385 }
 0x1db   :  { %v2354_v22 = vadd.f32 %v386_v21, %v356_v20 }
 0x1dc   :  { %v384_v25 = vpop.permute.xlu0 %383 }
 0x1dd   :  { %2021 = vtanh.f32 %v2354_v22  ;;  %v2357_v26 = vadd.f32 %v384_v25, %v355_v23 }
 0x1de   :  { %v390_v28 = vpop.permute.xlu1 %389 }
 0x1df   :  { %2023 = vtanh.f32 %v2357_v26  ;;  %v2360_v29 = vadd.f32 %v390_v28, %v358_v27 }
 0x1e0   :  { %v388_v31 = vpop.permute.xlu0 %387 }
 0x1e1   :  { %2025 = vtanh.f32 %v2360_v29  ;;  %v2363_v32 = vadd.f32 %v388_v31, %v357_v30 }
 0x1e3   :  { %2027 = vtanh.f32 %v2363_v32 }
 0x1ea   :  { %v2022_v33 = vpop.eup %2021 }
 0x1eb   :  { %409 = vrot.lane.b32.xlu1 %v2022_v33, %s2186_s17 }
 0x1ec   :  { %v2024_v34 = vpop.eup %2023 }
 0x1ed   :  { %407 = vrot.lane.b32.xlu0 %v2024_v34, %s2186_s17 }
 0x1ee   :  { %v2026_v35 = vpop.eup %2025 }
 0x1ef   :  { %413 = vrot.lane.b32.xlu1 %v2026_v35, %s2186_s17 }
 0x1f0   :  { %v2028_v36 = vpop.eup %2027 }
 0x1f1   :  { %411 = vrot.lane.b32.xlu0 %v2028_v36, %s2186_s17 }
 0x25d   :  { %v410_v38 = vpop.permute.xlu1 %409 }
 0x25e   :  { %v420_v39 = vmul.f32 %v410_v38, %v352_v57 }
 0x25f   :  { %v408_v40 = vpop.permute.xlu0 %407 }
 0x260   :  { %v419_v41 = vmul.f32 %v408_v40, %v351_v60  ;;  %429 = vrot.lane.b32.xlu1 %v420_v39, %s2188_s18 }
 0x261   :  { %v414_v42 = vpop.permute.xlu1 %413 }
 0x262   :  { %v422_v43 = vmul.f32 %v414_v42, %v354_v63  ;;  %427 = vrot.lane.b32.xlu0 %v419_v41, %s2188_s18 }
 0x263   :  { %v412_v44 = vpop.permute.xlu0 %411 }
 0x264   :  { %v421_v45 = vmul.f32 %v412_v44, %v353_v3  ;;  %433 = vrot.lane.b32.xlu1 %v422_v43, %s2188_s18 }
 0x266   :  { %431 = vrot.lane.b32.xlu0 %v421_v45, %s2188_s18 }
 0x268   :  { %80 = vperm.xlu1 %1994, %v2263_v7  }
 0x26a   :  { %76 = vperm.xlu0 %1993, %v2244_v4  }
 0x26c   :  { %84 = vperm.xlu1 %1994, %v2249_v5  }
 0x26e   :  { %88 = vperm.xlu0 %1993, %v2274_v9  }
 0x2d2   :  { %v430_v46 = vpop.permute.xlu1 %429 }
 0x2d4   :  { %v428_v47 = vpop.permute.xlu0 %427 }
 0x2d5   :  { %1896 = vmatprep.mubr.msk.f32.mxu1 %vm226_vm3, %v428_v47 }
 0x2d6   :  { %1897 = vmatmul.mubr.msk.f32.vlgmr.msra.gmra.mxu1 %vm226_vm3, %v430_v46  ;;  %v434_v49 = vpop.permute.xlu1 %433 }
 0x2d7   :  { %1917 = vmatpush3.msra.mxu1 %v2232_v0 }
 0x2d8   :  { %v432_v48 = vpop.permute.xlu0 %431  ;;  %1918 = vmatprep.subr.mxu1 %v2237_v1 }
 0x2d9   :  { %1899 = vmatprep.mubr.msk.f32.mxu1 %vm226_vm3, %v432_v48  ;;  %1919 = vmatpush3.msra.mxu1 %v2237_v1 }
 0x2da   :  { %1900 = vmatmul.mubr.msk.f32.gmra.mxu1 %vm226_vm3, %v434_v49  ;;  %1920 = vmatprep.subr.mxu1 %v2255_v6 }
 0x2db   :  { %1921 = vmatpush3.msra.mxu1 %v2255_v6 }
 0x2dc   :  { %1922 = vmatprep.subr.mxu1 %v2269_v8 }
 0x2dd   :  { %1923 = vmatpush3.msra.mxu1 %v2269_v8 }
 0x2de   :  { %1944 = vmatprep.subr.mxu1 %v2232_v0 }
 0x2e3   :  { %v81_v51 = vpop.permute.xlu1 %80 }
 0x2e4   :  { %v92_v52 = vmul.f32 %v2306_v14, %v81_v51 }
 0x2e5   :  { %v77_v50 = vpop.permute.xlu0 %76 }
 0x2e6   :  { %v91_v53 = vmul.f32 %v2306_v14, %v77_v50  ;;  %v96_v56 = vadd.f32 %v2312_v18, %v92_v52 }
 0x2e7   :  { %v85_v57 = vpop.permute.xlu1 %84 }
 0x2e8   :  { %v95_v59 = vadd.f32 %v2312_v18, %v91_v53  ;;  %v93_v61 = vmul.f32 %v2306_v14, %v85_v57 }
 0x2e9   :  { %v89_v55 = vpop.permute.xlu0 %88 }
 0x2ea   :  { %v94_v58 = vmul.f32 %v2306_v14, %v89_v55  ;;  %v97_v16 = vadd.f32 %v2312_v18, %v93_v61 }
 0x2ec   :  { %v98_v10 = vadd.f32 %v2312_v18, %v94_v58 }
 0x396   :  { %v1898_v60 = vpop.f32.mrf.mxu1 }
 0x397   :  { %v529_v62 = vadd.f32 %v1898_v60, %v96_v56 }
 0x398   :  { %v509_v63 = vpop.f32.mrf.mxu1 }
 0x399   :  { %v533_v2 = vmul.f32 %v529_v62, %v2323_v24  ;;  %v528_v3 = vadd.f32 %v509_v63, %v95_v59 }
 0x39a   :  { %v1901_v11 = vpop.f32.mrf.mxu1 }
 0x39b   :  { %v1773_v12 = vmul.f32 -1.442695, %v533_v2  ;;  %v532_v13 = vmul.f32 %v528_v3, %v2323_v24  ;;  %v531_v15 = vadd.f32 %v1901_v11, %v98_v10 }
 0x39c   :  { %v519_v17 = vpop.f32.mrf.mxu1 }
 0x39d   :  { %2029 = vpow2.f32 %v1773_v12  ;;  %v1772_v19 = vmul.f32 -1.442695, %v532_v13  ;;  %v535_v20 = vmul.f32 %v531_v15, %v2323_v24  ;;  %v530_v21 = vadd.f32 %v519_v17, %v97_v16 }
 0x39f   :  { %2031 = vpow2.f32 %v1772_v19  ;;  %v1775_v23 = vmul.f32 -1.442695, %v535_v20  ;;  %v534_v25 = vmul.f32 %v530_v21, %v2323_v24 }
 0x3a1   :  { %2033 = vpow2.f32 %v1775_v23  ;;  %v1774_v27 = vmul.f32 -1.442695, %v534_v25 }
 0x3a3   :  { %2035 = vpow2.f32 %v1774_v27 }
 0x3aa   :  { %v2030_v28 = vpop.eup %2029 }
 0x3ab   :  { %v549_v30 = vadd.f32 1.0, %v2030_v28 }
 0x3ac   :  { %v2032_v31 = vpop.eup %2031 }
 0x3ad   :  { %2037 = vrcp.f32 %v549_v30  ;;  %v548_v33 = vadd.f32 1.0, %v2032_v31 }
 0x3ae   :  { %v2034_v34 = vpop.eup %2033 }
 0x3af   :  { %2039 = vrcp.f32 %v548_v33  ;;  %v551_v35 = vadd.f32 1.0, %v2034_v34 }
 0x3b0   :  { %v2036_v36 = vpop.eup %2035 }
 0x3b1   :  { %2041 = vrcp.f32 %v551_v35  ;;  %v550_v37 = vadd.f32 1.0, %v2036_v36 }
 0x3b3   :  { %2043 = vrcp.f32 %v550_v37 }
 0x3ba   :  { %v2038_v38 = vpop.eup %2037 }
 0x3bb   :  { %v561_v39 = vmul.f32 %v2038_v38, %v2323_v24 }
 0x3bc   :  { %v2040_v40 = vpop.eup %2039 }
 0x3bd   :  { %v565_v41 = vsub.f32 %v561_v39, %v2336_v54  ;;  %v560_v42 = vmul.f32 %v2040_v40, %v2323_v24 }
 0x3be   :  { %v2042_v43 = vpop.eup %2041 }
 0x3bf   :  { %578 = vrot.lane.b32.xlu0 %v565_v41, %s2186_s17  ;;  %v564_v44 = vsub.f32 %v560_v42, %v2336_v54  ;;  %v563_v45 = vmul.f32 %v2042_v43, %v2323_v24  ;;  %v569_v59 = vmul.f32 %v565_v41, %v2354_v22 }
 0x3c0   :  { %v2044_v46 = vpop.eup %2043 }
 0x3c1   :  { %576 = vrot.lane.b32.xlu1 %v564_v44, %s2186_s17  ;;  %v567_v47 = vsub.f32 %v563_v45, %v2336_v54  ;;  %v562_v48 = vmul.f32 %v2044_v46, %v2323_v24  ;;  %v568_v62 = vmul.f32 %v564_v44, %v2357_v26 }
 0x3c3   :  { %582 = vrot.lane.b32.xlu0 %v567_v47, %s2186_s17  ;;  %v566_v49 = vsub.f32 %v562_v48, %v2336_v54  ;;  %v571_v3 = vmul.f32 %v567_v47, %v2360_v29 }
 0x3c5   :  { %580 = vrot.lane.b32.xlu1 %v566_v49, %s2186_s17  ;;  %v570_v12 = vmul.f32 %v566_v49, %v2363_v32  ;;  %v2189_v32 = vmov 2  }
 0x3c6   :  { %1995 = vset.pattern.permute.xlu1 %v2189_v32  ;;  %1996 = vset.pattern.permute.xlu0 %v2189_v32 }
 0x431   :  { %v579_v50 = vpop.permute.xlu0 %578 }
 0x432   :  { %v589_v51 = vmul.f32 %v579_v50, %v565_v41 }
 0x433   :  { %v577_v52 = vpop.permute.xlu1 %576 }
 0x434   :  { %v588_v53 = vmul.f32 %v577_v52, %v564_v44  ;;  %598 = vrot.lane.b32.xlu0 %v589_v51, %s2186_s17 }
 0x435   :  { %v583_v55 = vpop.permute.xlu0 %582 }
 0x436   :  { %v591_v56 = vmul.f32 %v583_v55, %v567_v47  ;;  %596 = vrot.lane.b32.xlu1 %v588_v53, %s2186_s17 }
 0x437   :  { %v581_v57 = vpop.permute.xlu1 %580 }
 0x438   :  { %v590_v58 = vmul.f32 %v581_v57, %v566_v49  ;;  %602 = vrot.lane.b32.xlu0 %v591_v56, %s2186_s17 }
 0x43a   :  { %600 = vrot.lane.b32.xlu1 %v590_v58, %s2186_s17 }
 0x4a6   :  { %v599_v60 = vpop.permute.xlu0 %598 }
 0x4a7   :  { %v2419_v61 = vadd.f32 %v599_v60, %v569_v59 }
 0x4a8   :  { %v597_v63 = vpop.permute.xlu1 %596 }
 0x4a9   :  { %2045 = vtanh.f32 %v2419_v61  ;;  %v2423_v2 = vadd.f32 %v597_v63, %v568_v62 }
 0x4aa   :  { %v603_v10 = vpop.permute.xlu0 %602 }
 0x4ab   :  { %2047 = vtanh.f32 %v2423_v2  ;;  %v2427_v11 = vadd.f32 %v603_v10, %v571_v3 }
 0x4ac   :  { %v601_v22 = vpop.permute.xlu1 %600 }
 0x4ad   :  { %2049 = vtanh.f32 %v2427_v11  ;;  %v2431_v13 = vadd.f32 %v601_v22, %v570_v12 }
 0x4af   :  { %2051 = vtanh.f32 %v2431_v13 }
 0x4b6   :  { %v2046_v26 = vpop.eup %2045 }
 0x4b7   :  { %622 = vrot.lane.b32.xlu0 %v2046_v26, %s2186_s17 }
 0x4b8   :  { %v2048_v15 = vpop.eup %2047 }
 0x4b9   :  { %620 = vrot.lane.b32.xlu1 %v2048_v15, %s2186_s17 }
 0x4ba   :  { %v2050_v29 = vpop.eup %2049 }
 0x4bb   :  { %626 = vrot.lane.b32.xlu0 %v2050_v29, %s2186_s17 }
 0x4bc   :  { %v2052_v16 = vpop.eup %2051 }
 0x4bd   :  { %624 = vrot.lane.b32.xlu1 %v2052_v16, %s2186_s17 }
 0x529   :  { %v623_v17 = vpop.permute.xlu0 %622 }
 0x52a   :  { %v633_v19 = vmul.f32 %v623_v17, %v565_v41 }
 0x52b   :  { %v621_v20 = vpop.permute.xlu1 %620 }
 0x52c   :  { %v632_v21 = vmul.f32 %v621_v20, %v564_v44  ;;  %642 = vrot.lane.b32.xlu0 %v633_v19, %s2188_s18 }
 0x52d   :  { %v627_v23 = vpop.permute.xlu0 %626 }
 0x52e   :  { %v635_v25 = vmul.f32 %v627_v23, %v567_v47  ;;  %640 = vrot.lane.b32.xlu1 %v632_v21, %s2188_s18 }
 0x52f   :  { %v625_v27 = vpop.permute.xlu1 %624 }
 0x530   :  { %v634_v28 = vmul.f32 %v625_v27, %v566_v49  ;;  %646 = vrot.lane.b32.xlu0 %v635_v25, %s2188_s18 }
 0x532   :  { %644 = vrot.lane.b32.xlu1 %v634_v28, %s2188_s18 }
 0x534   :  { %104 = vperm.xlu0 %1996, %v2263_v7  }
 0x536   :  { %100 = vperm.xlu1 %1995, %v2244_v4  }
 0x53a   :  { %108 = vperm.xlu1 %1995, %v2249_v5  }
 0x53e   :  { %112 = vperm.xlu1 %1995, %v2274_v9  }
 0x59e   :  { %v643_v30 = vpop.permute.xlu0 %642 }
 0x5a0   :  { %v641_v31 = vpop.permute.xlu1 %640 }
 0x5a1   :  { %1910 = vmatprep.mubr.msk.f32.mxu0 %vm226_vm3, %v641_v31 }
 0x5a2   :  { %1911 = vmatmul.mubr.msk.f32.vlgmr.msra.gmra.mxu0 %vm226_vm3, %v643_v30  ;;  %v647_v34 = vpop.permute.xlu0 %646 }
 0x5a3   :  { %1931 = vmatpush3.msra.mxu0 %v2232_v0 }
 0x5a4   :  { %v645_v33 = vpop.permute.xlu1 %644  ;;  %1932 = vmatprep.subr.mxu0 %v2237_v1 }
 0x5a5   :  { %1913 = vmatprep.mubr.msk.f32.mxu0 %vm226_vm3, %v645_v33  ;;  %1933 = vmatpush3.msra.mxu0 %v2237_v1 }
 0x5a6   :  { %1914 = vmatmul.mubr.msk.f32.gmra.mxu0 %vm226_vm3, %v647_v34  ;;  %1934 = vmatprep.subr.mxu0 %v2255_v6 }
 0x5a7   :  { %1935 = vmatpush3.msra.mxu0 %v2255_v6 }
 0x5a8   :  { %1936 = vmatprep.subr.mxu0 %v2269_v8 }
 0x5a9   :  { %1937 = vmatpush3.msra.mxu0 %v2269_v8 }
 0x5aa   :  { %1958 = vmatprep.subr.mxu0 %v2232_v0 }
 0x5af   :  { %v105_v37 = vpop.permute.xlu0 %104 }
 0x5b0   :  { %v116_v38 = vmul.f32 %v2306_v14, %v105_v37 }
 0x5b1   :  { %v101_v35 = vpop.permute.xlu1 %100 }
 0x5b2   :  { %v115_v40 = vmul.f32 %v2306_v14, %v101_v35  ;;  %v120_v41 = vadd.f32 %v2312_v18, %v116_v38 }
 0x5b4   :  { %v119_v46 = vadd.f32 %v2312_v18, %v115_v40 }
 0x5b5   :  { %v109_v36 = vpop.permute.xlu1 %108 }
 0x5b6   :  { %v117_v44 = vmul.f32 %v2306_v14, %v109_v36 }
 0x5b8   :  { %v121_v56 = vadd.f32 %v2312_v18, %v117_v44 }
 0x5b9   :  { %v113_v39 = vpop.permute.xlu1 %112 }
 0x5ba   :  { %v118_v42 = vmul.f32 %v2306_v14, %v113_v39 }
 0x5bc   :  { %v122_v50 = vadd.f32 %v2312_v18, %v118_v42 }
 0x662   :  { %v1912_v43 = vpop.f32.mrf.mxu0 }
 0x663   :  { %v742_v45 = vadd.f32 %v1912_v43, %v120_v41 }
 0x664   :  { %v722_v47 = vpop.f32.mrf.mxu0 }
 0x665   :  { %v746_v48 = vmul.f32 %v742_v45, %v2323_v24  ;;  %v741_v49 = vadd.f32 %v722_v47, %v119_v46 }
 0x666   :  { %v1915_v51 = vpop.f32.mrf.mxu0 }
 0x667   :  { %v1781_v52 = vmul.f32 -1.442695, %v746_v48  ;;  %v745_v53 = vmul.f32 %v741_v49, %v2323_v24  ;;  %v744_v55 = vadd.f32 %v1915_v51, %v122_v50 }
 0x668   :  { %v732_v57 = vpop.f32.mrf.mxu0 }
 0x669   :  { %2053 = vpow2.f32 %v1781_v52  ;;  %v1780_v58 = vmul.f32 -1.442695, %v745_v53  ;;  %v748_v59 = vmul.f32 %v744_v55, %v2323_v24  ;;  %v743_v60 = vadd.f32 %v732_v57, %v121_v56 }
 0x66b   :  { %2055 = vpow2.f32 %v1780_v58  ;;  %v1783_v62 = vmul.f32 -1.442695, %v748_v59  ;;  %v747_v63 = vmul.f32 %v743_v60, %v2323_v24 }
 0x66d   :  { %2057 = vpow2.f32 %v1783_v62  ;;  %v1782_v3 = vmul.f32 -1.442695, %v747_v63 }
 0x66f   :  { %2059 = vpow2.f32 %v1782_v3 }
 0x676   :  { %v2054_v10 = vpop.eup %2053 }
 0x677   :  { %v762_v12 = vadd.f32 1.0, %v2054_v10 }
 0x678   :  { %v2056_v22 = vpop.eup %2055 }
 0x679   :  { %2061 = vrcp.f32 %v762_v12  ;;  %v761_v26 = vadd.f32 1.0, %v2056_v22 }
 0x67a   :  { %v2058_v15 = vpop.eup %2057 }
 0x67b   :  { %2063 = vrcp.f32 %v761_v26  ;;  %v764_v29 = vadd.f32 1.0, %v2058_v15 }
 0x67c   :  { %v2060_v16 = vpop.eup %2059 }
 0x67d   :  { %2065 = vrcp.f32 %v764_v29  ;;  %v763_v32 = vadd.f32 1.0, %v2060_v16 }
 0x67f   :  { %2067 = vrcp.f32 %v763_v32 }
 0x686   :  { %v2062_v17 = vpop.eup %2061 }
 0x687   :  { %v774_v19 = vmul.f32 %v2062_v17, %v2323_v24 }
 0x688   :  { %v2064_v20 = vpop.eup %2063 }
 0x689   :  { %v778_v21 = vsub.f32 %v774_v19, %v2336_v54  ;;  %v773_v23 = vmul.f32 %v2064_v20, %v2323_v24 }
 0x68a   :  { %v2066_v25 = vpop.eup %2065 }
 0x68b   :  { %791 = vrot.lane.b32.xlu1 %v778_v21, %s2186_s17  ;;  %v777_v27 = vsub.f32 %v773_v23, %v2336_v54  ;;  %v776_v28 = vmul.f32 %v2066_v25, %v2323_v24  ;;  %v782_v43 = vmul.f32 %v778_v21, %v2419_v61 }
 0x68c   :  { %v2068_v30 = vpop.eup %2067 }
 0x68d   :  { %789 = vrot.lane.b32.xlu0 %v777_v27, %s2186_s17  ;;  %v780_v31 = vsub.f32 %v776_v28, %v2336_v54  ;;  %v775_v33 = vmul.f32 %v2068_v30, %v2323_v24  ;;  %v781_v46 = vmul.f32 %v777_v27, %v2423_v2 }
 0x68f   :  { %795 = vrot.lane.b32.xlu1 %v780_v31, %s2186_s17  ;;  %v779_v34 = vsub.f32 %v775_v33, %v2336_v54  ;;  %v784_v49 = vmul.f32 %v780_v31, %v2427_v11 }
 0x691   :  { %793 = vrot.lane.b32.xlu0 %v779_v34, %s2186_s17  ;;  %v783_v52 = vmul.f32 %v779_v34, %v2431_v13  ;;  %v2190_v13 = vmov 3  }
 0x692   :  { %1998 = vset.pattern.permute.xlu1 %v2190_v13  ;;  %1997 = vset.pattern.permute.xlu0 %v2190_v13 }
 0x6fd   :  { %v792_v35 = vpop.permute.xlu1 %791 }
 0x6fe   :  { %v802_v36 = vmul.f32 %v792_v35, %v778_v21 }
 0x6ff   :  { %v790_v37 = vpop.permute.xlu0 %789 }
 0x700   :  { %v801_v38 = vmul.f32 %v790_v37, %v777_v27  ;;  %811 = vrot.lane.b32.xlu1 %v802_v36, %s2186_s17 }
 0x701   :  { %v796_v39 = vpop.permute.xlu1 %795 }
 0x702   :  { %v804_v40 = vmul.f32 %v796_v39, %v780_v31  ;;  %809 = vrot.lane.b32.xlu0 %v801_v38, %s2186_s17 }
 0x703   :  { %v794_v41 = vpop.permute.xlu0 %793 }
 0x704   :  { %v803_v42 = vmul.f32 %v794_v41, %v779_v34  ;;  %815 = vrot.lane.b32.xlu1 %v804_v40, %s2186_s17 }
 0x706   :  { %813 = vrot.lane.b32.xlu0 %v803_v42, %s2186_s17 }
 0x772   :  { %v812_v44 = vpop.permute.xlu1 %811 }
 0x773   :  { %v2487_v45 = vadd.f32 %v812_v44, %v782_v43 }
 0x774   :  { %v810_v47 = vpop.permute.xlu0 %809 }
 0x775   :  { %2069 = vtanh.f32 %v2487_v45  ;;  %v2491_v48 = vadd.f32 %v810_v47, %v781_v46 }
 0x776   :  { %v816_v50 = vpop.permute.xlu1 %815 }
 0x777   :  { %2071 = vtanh.f32 %v2491_v48  ;;  %v2495_v51 = vadd.f32 %v816_v50, %v784_v49 }
 0x778   :  { %v814_v61 = vpop.permute.xlu0 %813 }
 0x779   :  { %2073 = vtanh.f32 %v2495_v51  ;;  %v2499_v53 = vadd.f32 %v814_v61, %v783_v52 }
 0x77b   :  { %2075 = vtanh.f32 %v2499_v53 }
 0x782   :  { %v2070_v2 = vpop.eup %2069 }
 0x783   :  { %835 = vrot.lane.b32.xlu1 %v2070_v2, %s2186_s17 }
 0x784   :  { %v2072_v55 = vpop.eup %2071 }
 0x785   :  { %833 = vrot.lane.b32.xlu0 %v2072_v55, %s2186_s17 }
 0x786   :  { %v2074_v11 = vpop.eup %2073 }
 0x787   :  { %839 = vrot.lane.b32.xlu1 %v2074_v11, %s2186_s17 }
 0x788   :  { %v2076_v56 = vpop.eup %2075 }
 0x789   :  { %837 = vrot.lane.b32.xlu0 %v2076_v56, %s2186_s17 }
 0x7f5   :  { %v836_v57 = vpop.permute.xlu1 %835 }
 0x7f6   :  { %v846_v58 = vmul.f32 %v836_v57, %v778_v21 }
 0x7f7   :  { %v834_v59 = vpop.permute.xlu0 %833 }
 0x7f8   :  { %v845_v60 = vmul.f32 %v834_v59, %v777_v27  ;;  %855 = vrot.lane.b32.xlu1 %v846_v58, %s2188_s18 }
 0x7f9   :  { %v840_v62 = vpop.permute.xlu1 %839 }
 0x7fa   :  { %v848_v63 = vmul.f32 %v840_v62, %v780_v31  ;;  %853 = vrot.lane.b32.xlu0 %v845_v60, %s2188_s18 }
 0x7fb   :  { %v838_v3 = vpop.permute.xlu0 %837 }
 0x7fc   :  { %v847_v10 = vmul.f32 %v838_v3, %v779_v34  ;;  %859 = vrot.lane.b32.xlu1 %v848_v63, %s2188_s18 }
 0x7fe   :  { %857 = vrot.lane.b32.xlu0 %v847_v10, %s2188_s18 }
 0x800   :  { %128 = vperm.xlu1 %1998, %v2263_v7  }
 0x802   :  { %124 = vperm.xlu0 %1997, %v2244_v4  }
 0x804   :  { %132 = vperm.xlu1 %1998, %v2249_v5  }
 0x806   :  { %136 = vperm.xlu0 %1997, %v2274_v9  }
 0x86a   :  { %v856_v12 = vpop.permute.xlu1 %855 }
 0x86c   :  { %v854_v22 = vpop.permute.xlu0 %853 }
 0x86d   :  { %1924 = vmatprep.mubr.msk.f32.mxu1 %vm226_vm3, %v854_v22 }
 0x86e   :  { %1925 = vmatmul.mubr.msk.f32.vlgmr.msra.gmra.mxu1 %vm226_vm3, %v856_v12  ;;  %v860_v15 = vpop.permute.xlu1 %859 }
 0x86f   :  { %1945 = vmatpush3.msra.mxu1 %v2232_v0 }
 0x870   :  { %v858_v26 = vpop.permute.xlu0 %857  ;;  %1946 = vmatprep.subr.mxu1 %v2237_v1 }
 0x871   :  { %1927 = vmatprep.mubr.msk.f32.mxu1 %vm226_vm3, %v858_v26  ;;  %1947 = vmatpush3.msra.mxu1 %v2237_v1 }
 0x872   :  { %1928 = vmatmul.mubr.msk.f32.gmra.mxu1 %vm226_vm3, %v860_v15  ;;  %1948 = vmatprep.subr.mxu1 %v2255_v6 }
 0x873   :  { %1949 = vmatpush3.msra.mxu1 %v2255_v6 }
 0x874   :  { %1950 = vmatprep.subr.mxu1 %v2269_v8 }
 0x875   :  { %1951 = vmatpush3.msra.mxu1 %v2269_v8 }
 0x876   :  { %1972 = vmatprep.subr.mxu1 %v2232_v0 }
 0x87b   :  { %v129_v5 = vpop.permute.xlu1 %128 }
 0x87c   :  { %v140_v7 = vmul.f32 %v2306_v14, %v129_v5 }
 0x87d   :  { %v125_v4 = vpop.permute.xlu0 %124 }
 0x87e   :  { %v139_v9 = vmul.f32 %v2306_v14, %v125_v4  ;;  %v144_v1 = vadd.f32 %v2312_v18, %v140_v7 }
 0x87f   :  { %v133_v16 = vpop.permute.xlu1 %132 }
 0x880   :  { %v143_v6 = vadd.f32 %v2312_v18, %v139_v9  ;;  %v141_v19 = vmul.f32 %v2306_v14, %v133_v16 }
 0x881   :  { %v137_v29 = vpop.permute.xlu0 %136 }
 0x882   :  { %v142_v32 = vmul.f32 %v2306_v14, %v137_v29  ;;  %v145_v31 = vadd.f32 %v2312_v18, %v141_v19 }
 0x884   :  { %v146_v23 = vadd.f32 %v2312_v18, %v142_v32 }
 0x92e   :  { %v1926_v17 = vpop.f32.mrf.mxu1 }
 0x92f   :  { %v955_v8 = vadd.f32 %v1926_v17, %v144_v1 }
 0x930   :  { %v935_v20 = vpop.f32.mrf.mxu1 }
 0x931   :  { %v959_v0 = vmul.f32 %v955_v8, %v2323_v24  ;;  %v954_v21 = vadd.f32 %v935_v20, %v143_v6 }
 0x932   :  { %v1929_v25 = vpop.f32.mrf.mxu1 }
 0x933   :  { %v1789_v27 = vmul.f32 -1.442695, %v959_v0  ;;  %v958_v28 = vmul.f32 %v954_v21, %v2323_v24  ;;  %v957_v30 = vadd.f32 %v1929_v25, %v146_v23 }
 0x934   :  { %v945_v33 = vpop.f32.mrf.mxu1 }
 0x935   :  { %2077 = vpow2.f32 %v1789_v27  ;;  %v1788_v34 = vmul.f32 -1.442695, %v958_v28  ;;  %v961_v35 = vmul.f32 %v957_v30, %v2323_v24  ;;  %v956_v14 = vadd.f32 %v945_v33, %v145_v31  ;;  %v2581_v30 = vld [vmem:[%s2834_s0 + $0x8] sm:$0xff]  ;;  %v2587_v31 = vld [vmem:[%s2834_s0] sm:$0xff]  ;;  %v2593_v33 = vld [vmem:[%s2834_s0 + $0x10] sm:$0xff] }
 0x937   :  { %2079 = vpow2.f32 %v1788_v34  ;;  %v1791_v36 = vmul.f32 -1.442695, %v961_v35  ;;  %v960_v37 = vmul.f32 %v956_v14, %v2323_v24  ;;  %v2599_v34 = vld [vmem:[%s2834_s0 + $0x18] sm:$0xff] }
 0x939   :  { %2081 = vpow2.f32 %v1791_v36  ;;  %v1790_v38 = vmul.f32 -1.442695, %v960_v37  ;;  %v2607_v36 = vld [vmem:[%s2833_s2 + $0x18] sm:$0xff] }
 0x93b   :  { %2083 = vpow2.f32 %v1790_v38  ;;  %v2613_v38 = vld [vmem:[%s2833_s2 + $0x10] sm:$0xff] }
 0x942   :  { %v2078_v39 = vpop.eup %2077 }
 0x943   :  { %v975_v40 = vadd.f32 1.0, %v2078_v39 }
 0x944   :  { %v2080_v41 = vpop.eup %2079 }
 0x945   :  { %2085 = vrcp.f32 %v975_v40  ;;  %v974_v42 = vadd.f32 1.0, %v2080_v41  ;;  %v2622_v40 = vld [vmem:[%s2833_s2 + $0x8] sm:$0xff]  ;;  %v2629_v41 = vld [vmem:[%s2833_s2] sm:$0xff] }
 0x946   :  { %v2082_v43 = vpop.eup %2081 }
 0x947   :  { %2087 = vrcp.f32 %v974_v42  ;;  %v977_v18 = vadd.f32 1.0, %v2082_v43 }
 0x948   :  { %v2084_v44 = vpop.eup %2083 }
 0x949   :  { %2089 = vrcp.f32 %v977_v18  ;;  %v976_v46 = vadd.f32 1.0, %v2084_v44  ;;  %v2636_v44 = vld [vmem:[%s2835_s1] ss:$0 sm:$0xff] }
 0x94b   :  { %2091 = vrcp.f32 %v976_v46 }
 0x952   :  { %v2086_v47 = vpop.eup %2085 }
 0x953   :  { %v987_v49 = vmul.f32 %v2086_v47, %v2323_v24 }
 0x954   :  { %v2088_v50 = vpop.eup %2087 }
 0x955   :  { %v991_v52 = vsub.f32 %v987_v49, %v2336_v54  ;;  %v986_v61 = vmul.f32 %v2088_v50, %v2323_v24  ;;  %v2643_v50 = vld [vmem:[%s2836_s3] ss:$0 sm:$0xff] }
 0x956   :  { %v2090_v2 = vpop.eup %2089 }
 0x957   :  { %1004 = vrot.lane.b32.xlu0 %v991_v52, %s2186_s17  ;;  %v990_v55 = vsub.f32 %v986_v61, %v2336_v54  ;;  %v989_v11 = vmul.f32 %v2090_v2, %v2323_v24  ;;  %v995_v26 = vmul.f32 %v991_v52, %v2487_v45 }
 0x958   :  { %v2092_v56 = vpop.eup %2091 }
 0x959   :  { %1002 = vrot.lane.b32.xlu1 %v990_v55, %s2186_s17  ;;  %v993_v13 = vsub.f32 %v989_v11, %v2336_v54  ;;  %v988_v57 = vmul.f32 %v2092_v56, %v2323_v24  ;;  %v994_v5 = vmul.f32 %v990_v55, %v2491_v48 }
 0x95b   :  { %1008 = vrot.lane.b32.xlu0 %v993_v13, %s2186_s17  ;;  %v992_v58 = vsub.f32 %v988_v57, %v2336_v54  ;;  %v997_v29 = vmul.f32 %v993_v13, %v2495_v51 }
 0x95d   :  { %1006 = vrot.lane.b32.xlu1 %v992_v58, %s2186_s17  ;;  %v996_v32 = vmul.f32 %v992_v58, %v2499_v53  ;;  %v2191_v53 = vmov 4  }
 0x95e   :  { %1999 = vset.pattern.permute.xlu1 %v2191_v53  ;;  %2000 = vset.pattern.permute.xlu0 %v2191_v53 }
 0x9c9   :  { %v1005_v59 = vpop.permute.xlu0 %1004 }
 0x9ca   :  { %v1015_v60 = vmul.f32 %v1005_v59, %v991_v52 }
 0x9cb   :  { %v1003_v62 = vpop.permute.xlu1 %1002 }
 0x9cc   :  { %v1014_v63 = vmul.f32 %v1003_v62, %v990_v55  ;;  %1024 = vrot.lane.b32.xlu0 %v1015_v60, %s2186_s17 }
 0x9cd   :  { %v1009_v3 = vpop.permute.xlu0 %1008 }
 0x9ce   :  { %v1017_v10 = vmul.f32 %v1009_v3, %v993_v13  ;;  %1022 = vrot.lane.b32.xlu1 %v1014_v63, %s2186_s17 }
 0x9cf   :  { %v1007_v12 = vpop.permute.xlu1 %1006 }
 0x9d0   :  { %v1016_v22 = vmul.f32 %v1007_v12, %v992_v58  ;;  %1028 = vrot.lane.b32.xlu0 %v1017_v10, %s2186_s17 }
 0x9d2   :  { %1026 = vrot.lane.b32.xlu1 %v1016_v22, %s2186_s17 }
 0xa3e   :  { %v1025_v15 = vpop.permute.xlu0 %1024 }
 0xa3f   :  { %v2555_v4 = vadd.f32 %v1025_v15, %v995_v26 }
 0xa40   :  { %v1023_v7 = vpop.permute.xlu1 %1022 }
 0xa41   :  { %2093 = vtanh.f32 %v2555_v4  ;;  %v2559_v9 = vadd.f32 %v1023_v7, %v994_v5 }
 0xa42   :  { %v1029_v1 = vpop.permute.xlu0 %1028 }
 0xa43   :  { %2095 = vtanh.f32 %v2559_v9  ;;  %v2563_v16 = vadd.f32 %v1029_v1, %v997_v29 }
 0xa44   :  { %v1027_v45 = vpop.permute.xlu1 %1026 }
 0xa45   :  { %2097 = vtanh.f32 %v2563_v16  ;;  %v2567_v6 = vadd.f32 %v1027_v45, %v996_v32 }
 0xa47   :  { %2099 = vtanh.f32 %v2567_v6 }
 0xa4e   :  { %v2094_v48 = vpop.eup %2093 }
 0xa4f   :  { %1048 = vrot.lane.b32.xlu0 %v2094_v48, %s2186_s17 }
 0xa50   :  { %v2096_v17 = vpop.eup %2095 }
 0xa51   :  { %1046 = vrot.lane.b32.xlu1 %v2096_v17, %s2186_s17 }
 0xa52   :  { %v2098_v51 = vpop.eup %2097 }
 0xa53   :  { %1052 = vrot.lane.b32.xlu0 %v2098_v51, %s2186_s17 }
 0xa54   :  { %v2100_v19 = vpop.eup %2099 }
 0xa55   :  { %1050 = vrot.lane.b32.xlu1 %v2100_v19, %s2186_s17 }
 0xac1   :  { %v1049_v8 = vpop.permute.xlu0 %1048 }
 0xac2   :  { %v1059_v20 = vmul.f32 %v1049_v8, %v991_v52 }
 0xac3   :  { %v1047_v0 = vpop.permute.xlu1 %1046 }
 0xac4   :  { %v1058_v21 = vmul.f32 %v1047_v0, %v990_v55  ;;  %1068 = vrot.lane.b32.xlu0 %v1059_v20, %s2188_s18 }
 0xac5   :  { %v1053_v23 = vpop.permute.xlu0 %1052 }
 0xac6   :  { %v1061_v25 = vmul.f32 %v1053_v23, %v993_v13  ;;  %1066 = vrot.lane.b32.xlu1 %v1058_v21, %s2188_s18 }
 0xac7   :  { %v1051_v27 = vpop.permute.xlu1 %1050 }
 0xac8   :  { %v1060_v28 = vmul.f32 %v1051_v27, %v992_v58  ;;  %1072 = vrot.lane.b32.xlu0 %v1061_v25, %s2188_s18 }
 0xaca   :  { %1070 = vrot.lane.b32.xlu1 %v1060_v28, %s2188_s18 }
 0xacc   :  { %152 = vperm.xlu0 %2000, %v2581_v30  }
 0xace   :  { %148 = vperm.xlu1 %1999, %v2587_v31  }
 0xad2   :  { %156 = vperm.xlu1 %1999, %v2593_v33  }
 0xad6   :  { %160 = vperm.xlu1 %1999, %v2599_v34  }
 0xb36   :  { %v1069_v35 = vpop.permute.xlu0 %1068 }
 0xb38   :  { %v1067_v14 = vpop.permute.xlu1 %1066 }
 0xb39   :  { %1938 = vmatprep.mubr.msk.f32.mxu0 %vm226_vm3, %v1067_v14 }
 0xb3a   :  { %1939 = vmatmul.mubr.msk.f32.vlgmr.msra.gmra.mxu0 %vm226_vm3, %v1069_v35  ;;  %v1073_v39 = vpop.permute.xlu0 %1072 }
 0xb3b   :  { %1959 = vmatpush3.msra.mxu0 %v2607_v36 }
 0xb3c   :  { %v1071_v37 = vpop.permute.xlu1 %1070  ;;  %1960 = vmatprep.subr.mxu0 %v2613_v38 }
 0xb3d   :  { %1941 = vmatprep.mubr.msk.f32.mxu0 %vm226_vm3, %v1071_v37  ;;  %1961 = vmatpush3.msra.mxu0 %v2613_v38 }
 0xb3e   :  { %1942 = vmatmul.mubr.msk.f32.gmra.mxu0 %vm226_vm3, %v1073_v39  ;;  %1962 = vmatprep.subr.mxu0 %v2622_v40 }
 0xb3f   :  { %1963 = vmatpush3.msra.mxu0 %v2622_v40 }
 0xb40   :  { %1964 = vmatprep.subr.mxu0 %v2629_v41 }
 0xb41   :  { %1965 = vmatpush3.msra.mxu0 %v2629_v41 }
 0xb47   :  { %v153_v18 = vpop.permute.xlu0 %152 }
 0xb48   :  { %v164_v46 = vmul.f32 %v2636_v44, %v153_v18 }
 0xb49   :  { %v149_v42 = vpop.permute.xlu1 %148 }
 0xb4a   :  { %v163_v49 = vmul.f32 %v2636_v44, %v149_v42  ;;  %v168_v52 = vadd.f32 %v2643_v50, %v164_v46 }
 0xb4c   :  { %v167_v56 = vadd.f32 %v2643_v50, %v163_v49 }
 0xb4d   :  { %v157_v43 = vpop.permute.xlu1 %156 }
 0xb4e   :  { %v165_v55 = vmul.f32 %v2636_v44, %v157_v43 }
 0xb50   :  { %v169_v10 = vadd.f32 %v2643_v50, %v165_v55 }
 0xb51   :  { %v161_v47 = vpop.permute.xlu1 %160 }
 0xb52   :  { %v166_v61 = vmul.f32 %v2636_v44, %v161_v47 }
 0xb54   :  { %v170_v59 = vadd.f32 %v2643_v50, %v166_v61 }
 0xbfa   :  { %v1940_v2 = vpop.f32.mrf.mxu0 }
 0xbfb   :  { %v1168_v11 = vadd.f32 %v1940_v2, %v168_v52 }
 0xbfc   :  { %v1148_v13 = vpop.f32.mrf.mxu0 }
 0xbfd   :  { %v1172_v57 = vmul.f32 %v1168_v11, %v2323_v24  ;;  %v1167_v58 = vadd.f32 %v1148_v13, %v167_v56 }
 0xbfe   :  { %v1943_v60 = vpop.f32.mrf.mxu0 }
 0xbff   :  { %v1797_v62 = vmul.f32 -1.442695, %v1172_v57  ;;  %v1171_v63 = vmul.f32 %v1167_v58, %v2323_v24  ;;  %v1170_v3 = vadd.f32 %v1943_v60, %v170_v59 }
 0xc00   :  { %v1158_v12 = vpop.f32.mrf.mxu0 }
 0xc01   :  { %2101 = vpow2.f32 %v1797_v62  ;;  %v1796_v22 = vmul.f32 -1.442695, %v1171_v63  ;;  %v1174_v26 = vmul.f32 %v1170_v3, %v2323_v24  ;;  %v1169_v15 = vadd.f32 %v1158_v12, %v169_v10 }
 0xc03   :  { %2103 = vpow2.f32 %v1796_v22  ;;  %v1799_v5 = vmul.f32 -1.442695, %v1174_v26  ;;  %v1173_v7 = vmul.f32 %v1169_v15, %v2323_v24 }
 0xc05   :  { %2105 = vpow2.f32 %v1799_v5  ;;  %v1798_v29 = vmul.f32 -1.442695, %v1173_v7 }
 0xc07   :  { %2107 = vpow2.f32 %v1798_v29 }
 0xc0e   :  { %v2102_v1 = vpop.eup %2101 }
 0xc0f   :  { %v1188_v32 = vadd.f32 1.0, %v2102_v1 }
 0xc10   :  { %v2104_v45 = vpop.eup %2103 }
 0xc11   :  { %2109 = vrcp.f32 %v1188_v32  ;;  %v1187_v48 = vadd.f32 1.0, %v2104_v45 }
 0xc12   :  { %v2106_v17 = vpop.eup %2105 }
 0xc13   :  { %2111 = vrcp.f32 %v1187_v48  ;;  %v1190_v51 = vadd.f32 1.0, %v2106_v17 }
 0xc14   :  { %v2108_v19 = vpop.eup %2107 }
 0xc15   :  { %2113 = vrcp.f32 %v1190_v51  ;;  %v1189_v53 = vadd.f32 1.0, %v2108_v19 }
 0xc17   :  { %2115 = vrcp.f32 %v1189_v53 }
 0xc1e   :  { %v2110_v8 = vpop.eup %2109 }
 0xc1f   :  { %v1200_v20 = vmul.f32 %v2110_v8, %v2323_v24 }
 0xc20   :  { %v2112_v0 = vpop.eup %2111 }
 0xc21   :  { %v1204_v21 = vsub.f32 %v1200_v20, %v2336_v54  ;;  %v1199_v23 = vmul.f32 %v2112_v0, %v2323_v24 }
 0xc22   :  { %v2114_v25 = vpop.eup %2113 }
 0xc23   :  { %1217 = vrot.lane.b32.xlu1 %v1204_v21, %s2186_s17  ;;  %v1203_v27 = vsub.f32 %v1199_v23, %v2336_v54  ;;  %v1202_v28 = vmul.f32 %v2114_v25, %v2323_v24  ;;  %v1208_v2 = vmul.f32 %v1204_v21, %v2555_v4 }
 0xc24   :  { %v2116_v35 = vpop.eup %2115 }
 0xc25   :  { %1215 = vrot.lane.b32.xlu0 %v1203_v27, %s2186_s17  ;;  %v1206_v14 = vsub.f32 %v1202_v28, %v2336_v54  ;;  %v1201_v37 = vmul.f32 %v2116_v35, %v2323_v24  ;;  %v1207_v56 = vmul.f32 %v1203_v27, %v2559_v9 }
 0xc27   :  { %1221 = vrot.lane.b32.xlu1 %v1206_v14, %s2186_s17  ;;  %v1205_v39 = vsub.f32 %v1201_v37, %v2336_v54  ;;  %v1210_v58 = vmul.f32 %v1206_v14, %v2563_v16 }
 0xc29   :  { %1219 = vrot.lane.b32.xlu0 %v1205_v39, %s2186_s17  ;;  %v1209_v62 = vmul.f32 %v1205_v39, %v2567_v6  ;;  %v2192_v6 = vmov 5  }
 0xc2a   :  { %2002 = vset.pattern.permute.xlu1 %v2192_v6  ;;  %2001 = vset.pattern.permute.xlu0 %v2192_v6 }
 0xc95   :  { %v1218_v42 = vpop.permute.xlu1 %1217 }
 0xc96   :  { %v1228_v43 = vmul.f32 %v1218_v42, %v1204_v21 }
 0xc97   :  { %v1216_v18 = vpop.permute.xlu0 %1215 }
 0xc98   :  { %v1227_v46 = vmul.f32 %v1216_v18, %v1203_v27  ;;  %1237 = vrot.lane.b32.xlu1 %v1228_v43, %s2186_s17 }
 0xc99   :  { %v1222_v47 = vpop.permute.xlu1 %1221 }
 0xc9a   :  { %v1230_v49 = vmul.f32 %v1222_v47, %v1206_v14  ;;  %1235 = vrot.lane.b32.xlu0 %v1227_v46, %s2186_s17 }
 0xc9b   :  { %v1220_v52 = vpop.permute.xlu0 %1219 }
 0xc9c   :  { %v1229_v61 = vmul.f32 %v1220_v52, %v1205_v39  ;;  %1241 = vrot.lane.b32.xlu1 %v1230_v49, %s2186_s17 }
 0xc9e   :  { %1239 = vrot.lane.b32.xlu0 %v1229_v61, %s2186_s17 }
 0xd0a   :  { %v1238_v55 = vpop.permute.xlu1 %1237 }
 0xd0b   :  { %v2672_v11 = vadd.f32 %v1238_v55, %v1208_v2 }
 0xd0c   :  { %v1236_v13 = vpop.permute.xlu0 %1235 }
 0xd0d   :  { %2117 = vtanh.f32 %v2672_v11  ;;  %v2676_v57 = vadd.f32 %v1236_v13, %v1207_v56 }
 0xd0e   :  { %v1242_v59 = vpop.permute.xlu1 %1241 }
 0xd0f   :  { %2119 = vtanh.f32 %v2676_v57  ;;  %v2680_v60 = vadd.f32 %v1242_v59, %v1210_v58 }
 0xd10   :  { %v1240_v4 = vpop.permute.xlu0 %1239 }
 0xd11   :  { %2121 = vtanh.f32 %v2680_v60  ;;  %v2684_v63 = vadd.f32 %v1240_v4, %v1209_v62 }
 0xd13   :  { %2123 = vtanh.f32 %v2684_v63 }
 0xd1a   :  { %v2118_v9 = vpop.eup %2117 }
 0xd1b   :  { %1261 = vrot.lane.b32.xlu1 %v2118_v9, %s2186_s17 }
 0xd1c   :  { %v2120_v3 = vpop.eup %2119 }
 0xd1d   :  { %1259 = vrot.lane.b32.xlu0 %v2120_v3, %s2186_s17 }
 0xd1e   :  { %v2122_v16 = vpop.eup %2121 }
 0xd1f   :  { %1265 = vrot.lane.b32.xlu1 %v2122_v16, %s2186_s17 }
 0xd20   :  { %v2124_v10 = vpop.eup %2123 }
 0xd21   :  { %1263 = vrot.lane.b32.xlu0 %v2124_v10, %s2186_s17 }
 0xd8d   :  { %v1262_v12 = vpop.permute.xlu1 %1261 }
 0xd8e   :  { %v1272_v22 = vmul.f32 %v1262_v12, %v1204_v21 }
 0xd8f   :  { %v1260_v26 = vpop.permute.xlu0 %1259 }
 0xd90   :  { %v1271_v15 = vmul.f32 %v1260_v26, %v1203_v27  ;;  %1281 = vrot.lane.b32.xlu1 %v1272_v22, %s2188_s18 }
 0xd91   :  { %v1266_v5 = vpop.permute.xlu1 %1265 }
 0xd92   :  { %v1274_v7 = vmul.f32 %v1266_v5, %v1206_v14  ;;  %1279 = vrot.lane.b32.xlu0 %v1271_v15, %s2188_s18 }
 0xd93   :  { %v1264_v29 = vpop.permute.xlu0 %1263 }
 0xd94   :  { %v1273_v1 = vmul.f32 %v1264_v29, %v1205_v39  ;;  %1285 = vrot.lane.b32.xlu1 %v1274_v7, %s2188_s18 }
 0xd96   :  { %1283 = vrot.lane.b32.xlu0 %v1273_v1, %s2188_s18 }
 0xd98   :  { %180 = vperm.xlu1 %2002, %v2593_v33  }
 0xd9a   :  { %172 = vperm.xlu0 %2001, %v2587_v31  }
 0xd9c   :  { %176 = vperm.xlu1 %2002, %v2581_v30  }
 0xd9e   :  { %184 = vperm.xlu0 %2001, %v2599_v34  }
 0xe02   :  { %v1282_v32 = vpop.permute.xlu1 %1281 }
 0xe04   :  { %v1280_v45 = vpop.permute.xlu0 %1279 }
 0xe05   :  { %1952 = vmatprep.mubr.msk.f32.mxu1 %vm226_vm3, %v1280_v45 }
 0xe06   :  { %1953 = vmatmul.mubr.msk.f32.vlgmr.msra.gmra.mxu1 %vm226_vm3, %v1282_v32  ;;  %v1286_v17 = vpop.permute.xlu1 %1285 }
 0xe07   :  { %1976 = vmatpush3.msra.mxu1 %v2607_v36 }
 0xe08   :  { %v1284_v48 = vpop.permute.xlu0 %1283  ;;  %1973 = vmatprep.subr.mxu1 %v2613_v38 }
 0xe09   :  { %1955 = vmatprep.mubr.msk.f32.mxu1 %vm226_vm3, %v1284_v48  ;;  %1977 = vmatpush3.msra.mxu1 %v2613_v38 }
 0xe0a   :  { %1956 = vmatmul.mubr.msk.f32.gmra.mxu1 %vm226_vm3, %v1286_v17  ;;  %1974 = vmatprep.subr.mxu1 %v2622_v40 }
 0xe0b   :  { %1978 = vmatpush3.msra.mxu1 %v2622_v40 }
 0xe0c   :  { %1975 = vmatprep.subr.mxu1 %v2629_v41 }
 0xe0d   :  { %1979 = vmatpush3.msra.mxu1 %v2629_v41 }
 0xe13   :  { %v181_v51 = vpop.permute.xlu1 %180 }
 0xe14   :  { %v189_v40 = vmul.f32 %v2636_v44, %v181_v51 }
 0xe15   :  { %v173_v36 = vpop.permute.xlu0 %172 }
 0xe16   :  { %v187_v8 = vmul.f32 %v2636_v44, %v173_v36  ;;  %v193_v43 = vadd.f32 %v2643_v50, %v189_v40 }
 0xe17   :  { %v177_v19 = vpop.permute.xlu1 %176 }
 0xe18   :  { %v188_v53 = vmul.f32 %v2636_v44, %v177_v19  ;;  %v191_v21 = vadd.f32 %v2643_v50, %v187_v8 }
 0xe19   :  { %v185_v20 = vpop.permute.xlu0 %184 }
 0xe1a   :  { %v192_v38 = vadd.f32 %v2643_v50, %v188_v53  ;;  %v190_v0 = vmul.f32 %v2636_v44, %v185_v20 }
 0xe1c   :  { %v194_v35 = vadd.f32 %v2643_v50, %v190_v0 }
 0xec6   :  { %v1954_v23 = vpop.f32.mrf.mxu1 }
 0xec7   :  { %v1381_v25 = vadd.f32 %v1954_v23, %v192_v38 }
 0xec8   :  { %v1361_v27 = vpop.f32.mrf.mxu1 }
 0xec9   :  { %v1385_v41 = vmul.f32 %v1381_v25, %v2323_v24  ;;  %v1380_v28 = vadd.f32 %v1361_v27, %v191_v21 }
 0xeca   :  { %v1957_v14 = vpop.f32.mrf.mxu1 }
 0xecb   :  { %v1805_v37 = vmul.f32 -1.442695, %v1385_v41  ;;  %v1384_v39 = vmul.f32 %v1380_v28, %v2323_v24  ;;  %v1383_v42 = vadd.f32 %v1957_v14, %v194_v35 }
 0xecc   :  { %v1371_v18 = vpop.f32.mrf.mxu1 }
 0xecd   :  { %2125 = vpow2.f32 %v1805_v37  ;;  %v1804_v46 = vmul.f32 -1.442695, %v1384_v39  ;;  %v1387_v47 = vmul.f32 %v1383_v42, %v2323_v24  ;;  %v1382_v49 = vadd.f32 %v1371_v18, %v193_v43 }
 0xece   :  { %v2193_v37 = vmov 6  }
 0xecf   :  { %2127 = vpow2.f32 %v1804_v46  ;;  %v1807_v52 = vmul.f32 -1.442695, %v1387_v47  ;;  %v1386_v61 = vmul.f32 %v1382_v49, %v2323_v24  ;;  %2003 = vset.pattern.permute.xlu1 %v2193_v37  ;;  %2004 = vset.pattern.permute.xlu0 %v2193_v37 }
 0xed1   :  { %2129 = vpow2.f32 %v1807_v52  ;;  %v1806_v2 = vmul.f32 -1.442695, %v1386_v61 }
 0xed3   :  { %2131 = vpow2.f32 %v1806_v2 }
 0xeda   :  { %v2126_v55 = vpop.eup %2125 }
 0xedb   :  { %v1401_v56 = vadd.f32 1.0, %v2126_v55 }
 0xedc   :  { %v2128_v13 = vpop.eup %2127 }
 0xedd   :  { %v1400_v58 = vadd.f32 1.0, %v2128_v13  ;;  %2133 = vrcp.f32 %v1401_v56 }
 0xede   :  { %v2130_v59 = vpop.eup %2129 }
 0xedf   :  { %2135 = vrcp.f32 %v1400_v58  ;;  %v1403_v62 = vadd.f32 1.0, %v2130_v59 }
 0xee0   :  { %v2132_v4 = vpop.eup %2131 }
 0xee1   :  { %v1402_v9 = vadd.f32 1.0, %v2132_v4  ;;  %2137 = vrcp.f32 %v1403_v62 }
 0xee3   :  { %2139 = vrcp.f32 %v1402_v9 }
 0xeea   :  { %v2134_v3 = vpop.eup %2133 }
 0xeeb   :  { %v1413_v22 = vmul.f32 %v2134_v3, %v2323_v24 }
 0xeec   :  { %v2136_v16 = vpop.eup %2135 }
 0xeed   :  { %v1412_v10 = vmul.f32 %v2136_v16, %v2323_v24  ;;  %v1417_v7 = vsub.f32 %v1413_v22, %v2336_v54 }
 0xeee   :  { %v2138_v6 = vpop.eup %2137 }
 0xeef   :  { %v1416_v12 = vsub.f32 %v1412_v10, %v2336_v54  ;;  %v1415_v29 = vmul.f32 %v2138_v6, %v2323_v24  ;;  %v1421_v0 = vmul.f32 %v1417_v7, %v2672_v11 }
 0xef0   :  { %v2140_v26 = vpop.eup %2139 }
 0xef1   :  { %1428 = vrot.lane.b32.xlu1 %v1416_v12, %s2186_s17  ;;  %v1414_v15 = vmul.f32 %v2140_v26, %v2323_v24  ;;  %v1419_v1 = vsub.f32 %v1415_v29, %v2336_v54  ;;  %v1420_v8 = vmul.f32 %v1416_v12, %v2676_v57 }
 0xef3   :  { %v1418_v5 = vsub.f32 %v1414_v15, %v2336_v54  ;;  %v1423_v41 = vmul.f32 %v1419_v1, %v2680_v60 }
 0xef5   :  { %1432 = vrot.lane.b32.xlu0 %v1418_v5, %s2186_s17  ;;  %1430 = vrot.lane.b32.xlu1 %v1417_v7, %s2186_s17  ;;  %v1422_v21 = vmul.f32 %v1418_v5, %v2684_v63 }
 0xef9   :  { %1434 = vrot.lane.b32.xlu0 %v1419_v1, %s2186_s17 }
 0xf63   :  { %v1429_v32 = vpop.permute.xlu1 %1428 }
 0xf64   :  { %v1440_v45 = vmul.f32 %v1429_v32, %v1416_v12 }
 0xf66   :  { %1448 = vrot.lane.b32.xlu1 %v1440_v45, %s2186_s17 }
 0xf67   :  { %v1431_v48 = vpop.permute.xlu1 %1430  ;;  %v1433_v17 = vpop.permute.xlu0 %1432 }
 0xf68   :  { %v1441_v51 = vmul.f32 %v1431_v48, %v1417_v7  ;;  %v1442_v36 = vmul.f32 %v1433_v17, %v1418_v5 }
 0xf6a   :  { %1450 = vrot.lane.b32.xlu1 %v1441_v51, %s2186_s17  ;;  %1452 = vrot.lane.b32.xlu0 %v1442_v36, %s2186_s17 }
 0xf6b   :  { %v1435_v19 = vpop.permute.xlu0 %1434 }
 0xf6c   :  { %v1443_v53 = vmul.f32 %v1435_v19, %v1419_v1 }
 0xf6e   :  { %1454 = vrot.lane.b32.xlu0 %v1443_v53, %s2186_s17 }
 0xfd8   :  { %v1449_v20 = vpop.permute.xlu1 %1448 }
 0xfd9   :  { %v2739_v38 = vadd.f32 %v1449_v20, %v1420_v8 }
 0xfdb   :  { %2141 = vtanh.f32 %v2739_v38 }
 0xfdc   :  { %v1451_v23 = vpop.permute.xlu1 %1450  ;;  %v1453_v40 = vpop.permute.xlu0 %1452 }
 0xfdd   :  { %v2744_v25 = vadd.f32 %v1451_v23, %v1421_v0  ;;  %v2746_v27 = vadd.f32 %v1453_v40, %v1422_v21 }
 0xfdf   :  { %2143 = vtanh.f32 %v2744_v25 }
 0xfe0   :  { %2145 = vtanh.f32 %v2746_v27  ;;  %v1455_v57 = vpop.permute.xlu0 %1454 }
 0xfe1   :  { %v2751_v28 = vadd.f32 %v1455_v57, %v1423_v41 }
 0xfe3   :  { %2147 = vtanh.f32 %v2751_v28 }
 0xfe8   :  { %v2142_v11 = vpop.eup %2141 }
 0xfe9   :  { %1472 = vrot.lane.b32.xlu1 %v2142_v11, %s2186_s17 }
 0xfec   :  { %v2144_v63 = vpop.eup %2143 }
 0xfed   :  { %v2146_v35 = vpop.eup %2145  ;;  %1474 = vrot.lane.b32.xlu1 %v2144_v63, %s2186_s17 }
 0xfee   :  { %1476 = vrot.lane.b32.xlu0 %v2146_v35, %s2186_s17 }
 0xff0   :  { %v2148_v14 = vpop.eup %2147 }
 0xff2   :  { %1478 = vrot.lane.b32.xlu0 %v2148_v14, %s2186_s17 }
0x105b   :  { %v1473_v60 = vpop.permute.xlu1 %1472 }
0x105c   :  { %v1484_v39 = vmul.f32 %v1473_v60, %v1416_v12 }
0x105e   :  { %1492 = vrot.lane.b32.xlu1 %v1484_v39, %s2188_s18 }
0x105f   :  { %v1475_v42 = vpop.permute.xlu1 %1474 }
0x1060   :  { %v1485_v43 = vmul.f32 %v1475_v42, %v1417_v7  ;;  %v1477_v18 = vpop.permute.xlu0 %1476 }
0x1061   :  { %v1486_v46 = vmul.f32 %v1477_v18, %v1418_v5 }
0x1062   :  { %1494 = vrot.lane.b32.xlu1 %v1485_v43, %s2188_s18 }
0x1063   :  { %1496 = vrot.lane.b32.xlu0 %v1486_v46, %s2188_s18 }
0x1064   :  { %v1479_v47 = vpop.permute.xlu0 %1478 }
0x1065   :  { %v1487_v49 = vmul.f32 %v1479_v47, %v1419_v1 }
0x1066   :  { %196 = vperm.xlu1 %2003, %v2587_v31  }
0x1067   :  { %1498 = vrot.lane.b32.xlu0 %v1487_v49, %s2188_s18 }
0x106a   :  { %204 = vperm.xlu1 %2003, %v2593_v33  }
0x106b   :  { %200 = vperm.xlu0 %2004, %v2581_v30  }
0x106e   :  { %208 = vperm.xlu1 %2003, %v2599_v34  }
0x10d0   :  { %v1493_v52 = vpop.permute.xlu1 %1492 }
0x10d1   :  { %1966 = vmatprep.mubr.msk.f32.mxu0 %vm226_vm3, %v1493_v52 }
0x10d4   :  { %v1495_v61 = vpop.permute.xlu1 %1494 }
0x10d5   :  { %v1497_v2 = vpop.permute.xlu0 %1496  ;;  %1967 = vmatmul.mubr.msk.f32.vlgmr.msra.gmra.mxu0 %vm226_vm3, %v1495_v61 }
0x10d6   :  { %1969 = vmatprep.mubr.msk.f32.mxu1 %vm226_vm3, %v1497_v2 }
0x10d9   :  { %v1499_v55 = vpop.permute.xlu0 %1498 }
0x10da   :  { %1970 = vmatmul.mubr.msk.f32.vlgmr.msra.gmra.mxu1 %vm226_vm3, %v1499_v55 }
0x10e1   :  { %v197_v31 = vpop.permute.xlu1 %196 }
0x10e2   :  { %v211_v30 = vmul.f32 %v2636_v44, %v197_v31 }
0x10e4   :  { %v215_v59 = vadd.f32 %v2643_v50, %v211_v30 }
0x10e5   :  { %v205_v13 = vpop.permute.xlu1 %204 }
0x10e6   :  { %v201_v56 = vpop.permute.xlu0 %200  ;;  %v213_v3 = vmul.f32 %v2636_v44, %v205_v13 }
0x10e7   :  { %v212_v33 = vmul.f32 %v2636_v44, %v201_v56 }
0x10e8   :  { %v217_v7 = vadd.f32 %v2643_v50, %v213_v3 }
0x10e9   :  { %v209_v34 = vpop.permute.xlu1 %208  ;;  %v216_v58 = vadd.f32 %v2643_v50, %v212_v33 }
0x10ea   :  { %v214_v62 = vmul.f32 %v2636_v44, %v209_v34 }
0x10ec   :  { %v218_v12 = vadd.f32 %v2643_v50, %v214_v62 }
0x1195   :  { %v1968_v4 = vpop.f32.mrf.mxu0 }
0x1196   :  { %v1594_v9 = vadd.f32 %v1968_v4, %v216_v58 }
0x1197   :  { %v1574_v16 = vpop.f32.mrf.mxu0 }
0x1198   :  { %v1598_v10 = vmul.f32 %v1594_v9, %v2323_v24  ;;  %v1593_v6 = vadd.f32 %v1574_v16, %v215_v59  ;;  %v11_v16 = vstv %s2838_s5 }
0x1199   :  { %12 = vst [vmem:[#allocation2] sm:$0x1] %v11_v16 }
0x119a   :  { %v1813_v22 = vmul.f32 -1.442695, %v1598_v10  ;;  %v1597_v26 = vmul.f32 %v1593_v6, %v2323_v24  ;;  %v1971_v15 = vpop.f32.mrf.mxu1 }
0x119b   :  { %v1596_v5 = vadd.f32 %v1971_v15, %v218_v12 }
0x119c   :  { %2149 = vpow2.f32 %v1813_v22  ;;  %v1812_v29 = vmul.f32 -1.442695, %v1597_v26  ;;  %v1584_v1 = vpop.f32.mrf.mxu1 }
0x119d   :  { %v1600_v32 = vmul.f32 %v1596_v5, %v2323_v24  ;;  %v1595_v45 = vadd.f32 %v1584_v1, %v217_v7 }
0x119e   :  { %2151 = vpow2.f32 %v1812_v29 }
0x119f   :  { %v1815_v44 = vmul.f32 -1.442695, %v1600_v32  ;;  %v1599_v48 = vmul.f32 %v1595_v45, %v2323_v24 }
0x11a1   :  { %2153 = vpow2.f32 %v1815_v44  ;;  %v1814_v17 = vmul.f32 -1.442695, %v1599_v48 }
0x11a3   :  { %2155 = vpow2.f32 %v1814_v17 }
0x11a9   :  { %v2150_v51 = vpop.eup %2149 }
0x11aa   :  { %v1614_v36 = vadd.f32 1.0, %v2150_v51 }
0x11ab   :  { %v2152_v19 = vpop.eup %2151 }
0x11ac   :  { %2157 = vrcp.f32 %v1614_v36  ;;  %v1613_v53 = vadd.f32 1.0, %v2152_v19 }
0x11ae   :  { %v2154_v8 = vpop.eup %2153  ;;  %2159 = vrcp.f32 %v1613_v53  ;;  %v1817_v53 = vld [vmem:[#allocation2] ss:$0 sm:$0xff] }
0x11af   :  { %v1616_v50 = vadd.f32 1.0, %v2154_v8 }
0x11b0   :  { %v2156_v20 = vpop.eup %2155 }
0x11b1   :  { %2161 = vrcp.f32 %v1616_v50  ;;  %v1615_v0 = vadd.f32 1.0, %v2156_v20 }
0x11b3   :  { %2163 = vrcp.f32 %v1615_v0 }
0x11b9   :  { %v2158_v21 = vpop.eup %2157 }
0x11ba   :  { %v1626_v23 = vmul.f32 %v2158_v21, %v2323_v24 }
0x11bb   :  { %v2160_v40 = vpop.eup %2159 }
0x11bc   :  { %v1630_v41 = vsub.f32 %v1626_v23, %v2336_v54  ;;  %v1625_v57 = vmul.f32 %v2160_v40, %v2323_v24 }
0x11be   :  { %v2162_v11 = vpop.eup %2161  ;;  %1643 = vrot.lane.b32.xlu1 %v1630_v41, %s2186_s17  ;;  %v1629_v63 = vsub.f32 %v1625_v57, %v2336_v54 }
0x11bf   :  { %v1628_v35 = vmul.f32 %v2162_v11, %v2323_v24 }
0x11c0   :  { %v2164_v14 = vpop.eup %2163  ;;  %1641 = vrot.lane.b32.xlu0 %v1629_v63, %s2186_s17  ;;  %v1633_v55 = vmul.f32 %v1629_v63, %v2739_v38 }
0x11c1   :  { %v1632_v60 = vsub.f32 %v1628_v35, %v2336_v54  ;;  %v1627_v37 = vmul.f32 %v2164_v14, %v2323_v24  ;;  %v1634_v24 = vmul.f32 %v1630_v41, %v2744_v25 }
0x11c3   :  { %1647 = vrot.lane.b32.xlu1 %v1632_v60, %s2186_s17  ;;  %v1631_v39 = vsub.f32 %v1627_v37, %v2336_v54  ;;  %v1636_v13 = vmul.f32 %v1632_v60, %v2751_v28 }
0x11c5   :  { %1645 = vrot.lane.b32.xlu0 %v1631_v39, %s2186_s17  ;;  %v1635_v34 = vmul.f32 %v1631_v39, %v2746_v27  ;;  %v1816_v27 = vld [vmem:[%s2837_s4] ss:$0 sm:$0xff] }
0x1230   :  { %v1644_v42 = vpop.permute.xlu1 %1643 }
0x1231   :  { %v1654_v43 = vmul.f32 %v1644_v42, %v1630_v41 }
0x1232   :  { %v1642_v18 = vpop.permute.xlu0 %1641 }
0x1233   :  { %v1653_v46 = vmul.f32 %v1642_v18, %v1629_v63  ;;  %1663 = vrot.lane.b32.xlu1 %v1654_v43, %s2186_s17 }
0x1235   :  { %v1648_v47 = vpop.permute.xlu1 %1647  ;;  %1661 = vrot.lane.b32.xlu0 %v1653_v46, %s2186_s17 }
0x1236   :  { %v1656_v49 = vmul.f32 %v1648_v47, %v1632_v60 }
0x1237   :  { %v1646_v52 = vpop.permute.xlu0 %1645 }
0x1238   :  { %v1655_v61 = vmul.f32 %v1646_v52, %v1631_v39  ;;  %1667 = vrot.lane.b32.xlu1 %v1656_v49, %s2186_s17 }
0x123a   :  { %1665 = vrot.lane.b32.xlu0 %v1655_v61, %s2186_s17 }
0x12a5   :  { %v1664_v54 = vpop.permute.xlu1 %1663 }
0x12a6   :  { %v1674_v2 = vadd.f32 %v1664_v54, %v1634_v24 }
0x12a7   :  { %v1662_v31 = vpop.permute.xlu0 %1661 }
0x12a8   :  { %2165 = vtanh.f32 %v1674_v2  ;;  %v1673_v56 = vadd.f32 %v1662_v31, %v1633_v55 }
0x12aa   :  { %2167 = vtanh.f32 %v1673_v56  ;;  %v1668_v33 = vpop.permute.xlu1 %1667 }
0x12ab   :  { %v1676_v30 = vadd.f32 %v1668_v33, %v1636_v13 }
0x12ac   :  { %v1666_v58 = vpop.permute.xlu0 %1665 }
0x12ad   :  { %2169 = vtanh.f32 %v1676_v30  ;;  %v1675_v59 = vadd.f32 %v1666_v58, %v1635_v34 }
0x12af   :  { %2171 = vtanh.f32 %v1675_v59 }
0x12b5   :  { %v2166_v62 = vpop.eup %2165 }
0x12b6   :  { %1687 = vrot.lane.b32.xlu1 %v2166_v62, %s2186_s17 }
0x12b7   :  { %v2168_v25 = vpop.eup %2167 }
0x12b8   :  { %1685 = vrot.lane.b32.xlu0 %v2168_v25, %s2186_s17 }
0x12ba   :  { %v2170_v38 = vpop.eup %2169 }
0x12bb   :  { %1691 = vrot.lane.b32.xlu1 %v2170_v38, %s2186_s17 }
0x12bc   :  { %v2172_v4 = vpop.eup %2171 }
0x12bd   :  { %1689 = vrot.lane.b32.xlu0 %v2172_v4, %s2186_s17 }
0x12c1   :  { %1707 = vrot.lane.b32.xlu0 %v1816_v27, %s2186_s17 }
0x1328   :  { %v1688_v9 = vpop.permute.xlu1 %1687 }
0x1329   :  { %v1698_v10 = vmul.f32 %v1688_v9, %v1630_v41 }
0x132a   :  { %v1686_v28 = vpop.permute.xlu0 %1685 }
0x132b   :  { %v1697_v6 = vmul.f32 %v1686_v28, %v1629_v63 }
0x132d   :  { %v1692_v12 = vpop.permute.xlu1 %1691 }
0x132e   :  { %v1700_v5 = vmul.f32 %v1692_v12, %v1632_v60 }
0x132f   :  { %v1690_v3 = vpop.permute.xlu0 %1689 }
0x1330   :  { %v1699_v7 = vmul.f32 %v1690_v3, %v1631_v39 }
0x1333   :  { %v1708_v22 = vpop.permute.xlu0 %1707 }
0x1334   :  { %v1710_v26 = vmul.f32 %v1708_v22, %v1697_v6  ;;  %v1711_v15 = vmul.f32 %v1708_v22, %v1698_v10  ;;  %v1712_v29 = vmul.f32 %v1708_v22, %v1699_v7  ;;  %v1713_v1 = vmul.f32 %v1708_v22, %v1700_v5 }
0x1336   :  { %1720 = vrot.lane.b32.xlu0 %v1711_v15, %s2188_s18  ;;  %1718 = vrot.lane.b32.xlu1 %v1710_v26, %s2188_s18 }
0x133a   :  { %1724 = vrot.lane.b32.xlu0 %v1713_v1, %s2188_s18  ;;  %1722 = vrot.lane.b32.xlu1 %v1712_v29, %s2188_s18 }
0x13a8   :  { %v1721_v32 = vpop.permute.xlu0 %1720  ;;  %v1719_v45 = vpop.permute.xlu1 %1718 }
0x13a9   :  { %v1733_v44 = vsel %vm226_vm3, %v1721_v32, 0.0  ;;  %v1730_v48 = vsel %vm226_vm3, %v1719_v45, 0.0 }
0x13aa   :  { %1734 = vadd.xlane.f32.xlu0 %v1733_v44  ;;  %1731 = vadd.xlane.f32.xlu1 %v1730_v48 }
0x13ac   :  { %v1725_v17 = vpop.permute.xlu0 %1724  ;;  %v1723_v51 = vpop.permute.xlu1 %1722 }
0x13ad   :  { %v1739_v36 = vsel %vm226_vm3, %v1725_v17, 0.0  ;;  %v1736_v19 = vsel %vm226_vm3, %v1723_v51, 0.0 }
0x13ae   :  { %1740 = vadd.xlane.f32.xlu1 %v1739_v36  ;;  %1737 = vadd.xlane.f32.xlu0 %v1736_v19 }
0x1433   :  { %v1735_v8 = vpop.xlane.xlu0 %1734  ;;  %v1732_v50 = vpop.xlane.xlu1 %1731 }
0x1434   :  { %v1750_v20 = vadd.f32 %v1817_v53, %v1735_v8  ;;  %v1749_v0 = vadd.f32 %v1817_v53, %v1732_v50 }
0x1436   :  { %1755 = vst.msk [vmem:[%s2839_s6 + $0x8] sm:$0xff] %vm1753_vm4, %v1750_v20  ;;  %1754 = vst.msk [vmem:[%s2839_s6] sm:$0xff] %vm1753_vm4, %v1749_v0 }
0x1437   :  { %v1738_v21 = vpop.xlane.xlu0 %1737  ;;  %v1741_v23 = vpop.xlane.xlu1 %1740 }
0x1438   :  { %v1751_v40 = vadd.f32 %v1817_v53, %v1738_v21  ;;  %v1752_v41 = vadd.f32 %v1817_v53, %v1741_v23 }
0x143a   :  { %1756 = vst.msk [vmem:[%s2839_s6 + $0x10] sm:$0xff] %vm1753_vm4, %v1751_v40  ;;  %1757 = vst.msk [vmem:[%s2839_s6 + $0x18] sm:$0xff] %vm1753_vm4, %v1752_v41 }

</bundles_post_ra>
